<compile_context>
chip_gen: v7x
topology: tpu7x:2x2x1
jax: 0.10.0
libtpu: 0.0.40
codegen_flags: <defaults>
</compile_context>

<pallas_src>
import jax
import jax.numpy as jnp
from jax import lax
from jax.experimental import pallas as pl
from jax.experimental.pallas import tpu as pltpu
import numpy as np


def _round_up(n, m):
    return ((n + m - 1) // m) * m


def rowlstm_forward(x, Wss, bss, Wis, bis, hidden_dim, batch_groups=1):
    """x: (B, C, S, W) float32.  Returns (B, H, S, W) like the torch module."""
    B, C, S, W = x.shape
    H = hidden_dim
    assert C == H, "module only type-checks when in_channels == hidden_dim"
    G = batch_groups
    assert B % G == 0
    BG = B // G
    NW = BG * W                       # lane width: batch folded into width axis

    HP = _round_up(H, 8)              # pad each gate block to 8 sublanes
    XR = _round_up(2 * C, 8)          # rows of the [x_{w-1}; x_w] block
    K = 3 * HP + XR                   # fused contraction dimension

    # ---------------- weight / bias prep (once, outside the kernel) -------
    Wss = Wss.astype(jnp.float32)
    Wis_m = Wis.astype(jnp.float32).at[:, :, 2].set(0.0)   # mask 'B', k=3
    bsum = (bss + bis).astype(jnp.float32)

    Wf = jnp.zeros((4 * HP, K), jnp.float32)
    bias = jnp.zeros((4 * HP, 1), jnp.float32)
    for g_idx in range(4):            # gate order i, g, f, o (torch.split order)
        dst = slice(g_idx * HP, g_idx * HP + H)
        src = slice(g_idx * H, (g_idx + 1) * H)
        Wf = Wf.at[dst, 0 * HP:0 * HP + H].set(Wss[src, :, 0])            # * h_{w-1}
        Wf = Wf.at[dst, 1 * HP:1 * HP + H].set(Wss[src, :, 1])            # * h_w
        Wf = Wf.at[dst, 2 * HP:2 * HP + H].set(Wss[src, :, 2])            # * h_{w+1}
        Wf = Wf.at[dst, 3 * HP:3 * HP + C].set(Wis_m[src, :, 0])          # * x_{w-1}
        Wf = Wf.at[dst, 3 * HP + C:3 * HP + 2 * C].set(Wis_m[src, :, 1])  # * x_w
        bias = bias.at[dst, 0].set(bsum[src])

    # ---------------- input prep: (B,C,S,W) -> (G, S, XR, BG*W) -----------
    xf = x.astype(jnp.float32)
    # x shifted right by one pixel (tap k=0 operand), zero at w=0.
    x_rm = jnp.concatenate([jnp.zeros_like(xf[..., :1]), xf[..., :-1]], axis=-1)

    def to_lanes(t):                  # (B, C, S, W) -> (G, S, C, BG*W)
        t = t.reshape(G, BG, C, S, W)
        t = jnp.transpose(t, (0, 3, 2, 1, 4))      # (G, S, C, BG, W)
        return t.reshape(G, S, C, NW)

    x_stack = jnp.concatenate([to_lanes(x_rm), to_lanes(xf)], axis=2)
    if XR > 2 * C:
        x_stack = jnp.concatenate(
            [x_stack, jnp.zeros((G, S, XR - 2 * C, NW), jnp.float32)], axis=2)

    # ---------------- kernel ----------------------------------------------
    def kernel(x_ref, w_ref, b_ref, out_ref):
        w = w_ref[...]                                        # (4HP, K)  hoisted
        bias_b = jnp.broadcast_to(b_ref[...], (4 * HP, NW))   # hoisted broadcast
        col = lax.broadcasted_iota(jnp.int32, (HP, NW), 1)
        keep_prev = (col % W) != 0            # zero wrapped w-1 column per image
        keep_next = (col % W) != (W - 1)      # zero wrapped w+1 column per image

        def step(s, carry):
            c_prev, h_prev = carry
            # width-3 conv taps via XLU roll + boundary mask (mask also kills
            # cross-batch wrap: batch boundaries are multiples of W).
            h_rm = jnp.where(keep_prev, pltpu.roll(h_prev, 1, 1), 0.0)
            h_lm = jnp.where(keep_next, pltpu.roll(h_prev, NW - 1, 1), 0.0)
            x_s = x_ref[0, s]                                 # (XR, NW)
            stacked = jnp.concatenate([h_rm, h_prev, h_lm, x_s], axis=0)
            pre = jnp.dot(w, stacked,
                          preferred_element_type=jnp.float32) + bias_b
            gates = jax.nn.sigmoid(pre)       # reference sigmoids ALL 4 gates
            i_g = gates[0 * HP:1 * HP]        # 8-row tile-aligned slices
            g_g = gates[1 * HP:2 * HP]
            f_g = gates[2 * HP:3 * HP]
            o_g = gates[3 * HP:4 * HP]
            c_new = f_g * c_prev + i_g * g_g
            h_new = o_g * jnp.tanh(c_new)
            out_ref[0, s] = h_new
            return (c_new, h_new)

        zero = jnp.zeros((HP, NW), jnp.float32)   # torch init_state is zeros
        lax.fori_loop(0, S, step, (zero, zero), unroll=True)

    grid_spec = pltpu.PrefetchScalarGridSpec(
        num_scalar_prefetch=0,
        grid=(G,),
        in_specs=[
            pl.BlockSpec((1, S, XR, NW), lambda g: (g, 0, 0, 0)),
            pl.BlockSpec((4 * HP, K), lambda g: (0, 0)),
            pl.BlockSpec((4 * HP, 1), lambda g: (0, 0)),
        ],
        out_specs=pl.BlockSpec((1, S, HP, NW), lambda g: (g, 0, 0, 0)),
    )

    h_steps = pl.pallas_call(
        kernel,
        out_shape=jax.ShapeDtypeStruct((G, S, HP, NW), jnp.float32),
        grid_spec=grid_spec,
        compiler_params=pltpu.CompilerParams(
            dimension_semantics=("parallel",)),   # batch groups are independent
    )(x_stack, Wf, bias)

    # ------------- unfold lanes / drop pad rows, then torch's glue --------
    out = h_steps[:, :, :H, :]                    # (G, S, H, BG*W)
    out = out.reshape(G, S, H, BG, W)
    out = jnp.transpose(out, (0, 3, 1, 2, 4))     # (G, BG, S, H, W)
    out = out.reshape(B, S, H, W)
    out = out.reshape(B, S, H * W)                # torch: h flattened (H, W)
    out = out.reshape(B, S, W, H)                 # torch .view(-1, S, W, H)
    out = jnp.transpose(out, (0, 3, 1, 2))        # torch .permute(0, 3, 1, 2)
    return out


def ref_rowlstm(x, Wss, bss, Wis, bis, H):
    """Pure-JAX reference that mirrors the PyTorch forward line by line."""
    B, C, S, W = x.shape
    Wis_m = Wis.at[:, :, 2].set(0.0)
    dn = ('NCH', 'OIH', 'NCH')
    c = jnp.zeros((B, H * W), jnp.float32)
    h = jnp.zeros((B, H * W), jnp.float32)
    outs = []
    for s in range(S):
        hp = h.reshape(B, H, W)
        inp = x[:, :, s, :]
        s_s = lax.conv_general_dilated(hp, Wss, (1,), [(1, 1)],
                                       dimension_numbers=dn) + bss[None, :, None]
        i_s = lax.conv_general_dilated(inp, Wis_m, (1,), [(1, 1)],
                                       dimension_numbers=dn) + bis[None, :, None]
        lstm = jax.nn.sigmoid((s_s + i_s).reshape(B, 4 * H * W))
        i_g, g_g, f_g, o_g = jnp.split(lstm, 4, axis=1)
        c = f_g * c + i_g * g_g
        h = o_g * jnp.tanh(c)
        outs.append(h)
    out = jnp.stack(outs, axis=1)                 # (B, S, H*W)
    out = out.reshape(B, S, W, H).transpose(0, 3, 1, 2)
    return out


if __name__ == "__main__":
    B, C, S, W = 2, 4, 16, 16
    H = 4   # must equal C (see note at top)

    key = jax.random.PRNGKey(0)
    k1, k2, k3, k4, k5 = jax.random.split(key, 5)
    x = jax.random.normal(k1, (B, C, S, W), jnp.float32)
    # conv_s_s: nn.Conv1d(in_channels, 4*hidden, k=3) -> weight (4H, C, 3)
    Wss = jax.random.normal(k2, (4 * H, C, 3), jnp.float32) * 0.1
    bss = jax.random.normal(k3, (4 * H,), jnp.float32) * 0.1
    # conv_i_s: MaskedConv1d('B', hidden, 4*hidden, k=3) -> weight (4H, H, 3)
    Wis = jax.random.normal(k4, (4 * H, H, 3), jnp.float32) * 0.1
    bis = jax.random.normal(k5, (4 * H,), jnp.float32) * 0.1

    ref = ref_rowlstm(x, Wss, bss, Wis, bis, H)

    # Default path: single kernel invocation, batch folded into lanes.
    out = rowlstm_forward(x, Wss, bss, Wis, bis, H, batch_groups=1)
    out = jax.block_until_ready(out)
    assert out.shape == (B, H, S, W)
    np.testing.assert_allclose(np.asarray(out), np.asarray(ref),
                               rtol=2e-5, atol=2e-5)

    # v7x-style path: batch split across a "parallel" grid axis (2 TensorCores).
    out2 = rowlstm_forward(x, Wss, bss, Wis, bis, H, batch_groups=2)
    out2 = jax.block_until_ready(out2)
    np.testing.assert_allclose(np.asarray(out2), np.asarray(ref),
                               rtol=2e-5, atol=2e-5)

    print("KERNEL_OK")
</pallas_src>

<mosaic_0001>
module attributes {stable_mosaic.version = 11 : i64} {
  func.func @kernel(%arg0: i32, %arg1: memref<1x16x8x32xf32, #tpu.memory_space<vmem>>, %arg2: memref<32x32xf32, #tpu.memory_space<vmem>>, %arg3: memref<32x1xf32, #tpu.memory_space<vmem>>, %arg4: memref<1x16x8x32xf32, #tpu.memory_space<vmem>>) attributes {dimension_semantics = [#tpu.dimension_semantics<parallel>], iteration_bounds = array<i64: 1>, scalar_prefetch = 0 : i64, scratch_operands = 0 : i64, tpu.core_type = #tpu.core_type<tc>, window_params = [{transform_indices = @transform_0, window_bounds = array<i64: 1, 16, 8, 32>}, {pipeline_mode = #tpu.pipeline_mode<synchronous>, transform_indices = @transform_1, window_bounds = array<i64: 32, 32>}, {pipeline_mode = #tpu.pipeline_mode<synchronous>, transform_indices = @transform_2, window_bounds = array<i64: 32, 1>}, {transform_indices = @transform_3, window_bounds = array<i64: 1, 16, 8, 32>}]} {
    %c0 = arith.constant 0 : index
    %c0_0 = arith.constant 0 : index
    %0 = vector.load %arg2[%c0, %c0_0] : memref<32x32xf32, #tpu.memory_space<vmem>>, vector<32x32xf32>
    %c0_1 = arith.constant 0 : index
    %c0_2 = arith.constant 0 : index
    %1 = vector.load %arg3[%c0_1, %c0_2] : memref<32x1xf32, #tpu.memory_space<vmem>>, vector<32x1xf32>
    %2 = vector.shape_cast %1 : vector<32x1xf32> to vector<32x1xf32>
    %3 = vector.broadcast %2 : vector<32x1xf32> to vector<32x32xf32>
    %4 = tpu.iota {dimensions = array<i32: 1>} : vector<8x32xi32>
    %c16_i32 = arith.constant 16 : i32
    %c0_i32 = arith.constant 0 : i32
    %5 = arith.cmpi eq, %c16_i32, %c0_i32 : i32
    %c1_i32 = arith.constant 1 : i32
    %6 = arith.select %5, %c1_i32, %c16_i32 : i32
    %7 = vector.broadcast %6 : i32 to vector<8x32xi32>
    %8 = arith.remsi %4, %7 : vector<8x32xi32>
    %c0_i32_3 = arith.constant 0 : i32
    %9 = vector.broadcast %c0_i32_3 : i32 to vector<8x32xi32>
    %10 = arith.cmpi ne, %8, %9 : vector<8x32xi32>
    %c0_i32_4 = arith.constant 0 : i32
    %11 = vector.broadcast %c0_i32_4 : i32 to vector<8x32xi32>
    %12 = arith.cmpi slt, %8, %11 : vector<8x32xi32>
    %c0_i32_5 = arith.constant 0 : i32
    %13 = arith.cmpi slt, %6, %c0_i32_5 : i32
    %14 = vector.broadcast %13 : i1 to vector<8x32xi1>
    %15 = vector.broadcast %14 : vector<8x32xi1> to vector<8x32xi1>
    %16 = arith.xori %12, %15 : vector<8x32xi1>
    %17 = arith.andi %16, %10 : vector<8x32xi1>
    %18 = vector.broadcast %6 : i32 to vector<8x32xi32>
    %19 = arith.addi %8, %18 : vector<8x32xi32>
    %20 = arith.select %17, %19, %8 : vector<8x32xi1>, vector<8x32xi32>
    %c0_i32_6 = arith.constant 0 : i32
    %21 = vector.broadcast %c0_i32_6 : i32 to vector<8x32xi32>
    %22 = arith.cmpi ne, %20, %21 : vector<8x32xi32>
    %c16_i32_7 = arith.constant 16 : i32
    %c0_i32_8 = arith.constant 0 : i32
    %23 = arith.cmpi eq, %c16_i32_7, %c0_i32_8 : i32
    %c1_i32_9 = arith.constant 1 : i32
    %24 = arith.select %23, %c1_i32_9, %c16_i32_7 : i32
    %25 = vector.broadcast %24 : i32 to vector<8x32xi32>
    %26 = arith.remsi %4, %25 : vector<8x32xi32>
    %c0_i32_10 = arith.constant 0 : i32
    %27 = vector.broadcast %c0_i32_10 : i32 to vector<8x32xi32>
    %28 = arith.cmpi ne, %26, %27 : vector<8x32xi32>
    %c0_i32_11 = arith.constant 0 : i32
    %29 = vector.broadcast %c0_i32_11 : i32 to vector<8x32xi32>
    %30 = arith.cmpi slt, %26, %29 : vector<8x32xi32>
    %c0_i32_12 = arith.constant 0 : i32
    %31 = arith.cmpi slt, %24, %c0_i32_12 : i32
    %32 = vector.broadcast %31 : i1 to vector<8x32xi1>
    %33 = vector.broadcast %32 : vector<8x32xi1> to vector<8x32xi1>
    %34 = arith.xori %30, %33 : vector<8x32xi1>
    %35 = arith.andi %34, %28 : vector<8x32xi1>
    %36 = vector.broadcast %24 : i32 to vector<8x32xi32>
    %37 = arith.addi %26, %36 : vector<8x32xi32>
    %38 = arith.select %35, %37, %26 : vector<8x32xi1>, vector<8x32xi32>
    %c15_i32 = arith.constant 15 : i32
    %39 = vector.broadcast %c15_i32 : i32 to vector<8x32xi32>
    %40 = arith.cmpi ne, %38, %39 : vector<8x32xi32>
    %cst = arith.constant 0.000000e+00 : f32
    %41 = vector.broadcast %cst : f32 to vector<8x32xf32>
    %c0_i32_13 = arith.constant 0 : i32
    %c1_i32_14 = arith.constant 1 : i32
    %42 = tpu.dynamic_rotate %41 by %c1_i32_14 dim 1 : vector<8x32xf32>, i32 -> vector<8x32xf32>
    %cst_15 = arith.constant 0.000000e+00 : f32
    %43 = vector.broadcast %cst_15 : f32 to vector<8x32xf32>
    %44 = arith.select %22, %42, %43 : vector<8x32xi1>, vector<8x32xf32>
    %c31_i32 = arith.constant 31 : i32
    %45 = tpu.dynamic_rotate %41 by %c31_i32 dim 1 : vector<8x32xf32>, i32 -> vector<8x32xf32>
    %cst_16 = arith.constant 0.000000e+00 : f32
    %46 = vector.broadcast %cst_16 : f32 to vector<8x32xf32>
    %47 = arith.select %40, %45, %46 : vector<8x32xi1>, vector<8x32xf32>
    %c0_17 = arith.constant 0 : index
    %48 = arith.index_cast %c0_i32_13 : i32 to index
    %c0_18 = arith.constant 0 : index
    %c0_19 = arith.constant 0 : index
    %49 = vector.load %arg1[%c0_17, %48, %c0_18, %c0_19] : memref<1x16x8x32xf32, #tpu.memory_space<vmem>>, vector<1x1x8x32xf32>
    %50 = vector.shape_cast %49 : vector<1x1x8x32xf32> to vector<8x32xf32>
    %51 = tpu.concatenate %44, %41, %47, %50 in 0 : vector<8x32xf32>, vector<8x32xf32>, vector<8x32xf32>, vector<8x32xf32> -> vector<32x32xf32>
    %cst_20 = arith.constant dense<0.000000e+00> : vector<32x32xf32>
    %52 = tpu.matmul %0, %51, %cst_20 {dimension_numbers = #tpu.dot_dimension_numbers<[1], [0], [0], [1], [0, 0, 1, 1], [], []>} : vector<32x32xf32>, vector<32x32xf32>, vector<32x32xf32> -> vector<32x32xf32>
    %53 = arith.addf %52, %3 : vector<32x32xf32>
    %54 = arith.negf %53 : vector<32x32xf32>
    %55 = math.exp %54 : vector<32x32xf32>
    %cst_21 = arith.constant 1.000000e+00 : f32
    %56 = vector.broadcast %cst_21 : f32 to vector<32x32xf32>
    %57 = arith.addf %56, %55 : vector<32x32xf32>
    %58 = arith.divf %56, %57 : vector<32x32xf32>
    %59 = vector.extract_strided_slice %58 {offsets = [0, 0], sizes = [8, 32], strides = [1, 1]} : vector<32x32xf32> to vector<8x32xf32>
    %60 = vector.extract_strided_slice %58 {offsets = [8, 0], sizes = [8, 32], strides = [1, 1]} : vector<32x32xf32> to vector<8x32xf32>
    %61 = vector.extract_strided_slice %58 {offsets = [16, 0], sizes = [8, 32], strides = [1, 1]} : vector<32x32xf32> to vector<8x32xf32>
    %62 = vector.extract_strided_slice %58 {offsets = [24, 0], sizes = [8, 32], strides = [1, 1]} : vector<32x32xf32> to vector<8x32xf32>
    %63 = arith.mulf %61, %41 : vector<8x32xf32>
    %64 = arith.mulf %59, %60 : vector<8x32xf32>
    %65 = arith.addf %63, %64 : vector<8x32xf32>
    %66 = math.tanh %65 : vector<8x32xf32>
    %67 = arith.mulf %62, %66 : vector<8x32xf32>
    %c0_22 = arith.constant 0 : index
    %68 = arith.index_cast %c0_i32_13 : i32 to index
    %c0_23 = arith.constant 0 : index
    %c0_24 = arith.constant 0 : index
    %69 = vector.load %arg4[%c0_22, %68, %c0_23, %c0_24] : memref<1x16x8x32xf32, #tpu.memory_space<vmem>>, vector<1x1x8x32xf32>
    %70 = vector.shape_cast %69 : vector<1x1x8x32xf32> to vector<8x32xf32>
    %71 = vector.shape_cast %67 : vector<8x32xf32> to vector<1x1x8x32xf32>
    tpu.vector_store %arg4[%c0_22, %68, %c0_23, %c0_24], %71 {strides = array<i32>} : memref<1x16x8x32xf32, #tpu.memory_space<vmem>>, vector<1x1x8x32xf32>,
    %c1_i32_25 = arith.constant 1 : i32
    %c1_i32_26 = arith.constant 1 : i32
    %72 = tpu.dynamic_rotate %67 by %c1_i32_26 dim 1 : vector<8x32xf32>, i32 -> vector<8x32xf32>
    %cst_27 = arith.constant 0.000000e+00 : f32
    %73 = vector.broadcast %cst_27 : f32 to vector<8x32xf32>
    %74 = arith.select %22, %72, %73 : vector<8x32xi1>, vector<8x32xf32>
    %c31_i32_28 = arith.constant 31 : i32
    %75 = tpu.dynamic_rotate %67 by %c31_i32_28 dim 1 : vector<8x32xf32>, i32 -> vector<8x32xf32>
    %cst_29 = arith.constant 0.000000e+00 : f32
    %76 = vector.broadcast %cst_29 : f32 to vector<8x32xf32>
    %77 = arith.select %40, %75, %76 : vector<8x32xi1>, vector<8x32xf32>
    %c0_30 = arith.constant 0 : index
    %78 = arith.index_cast %c1_i32_25 : i32 to index
    %c0_31 = arith.constant 0 : index
    %c0_32 = arith.constant 0 : index
    %79 = vector.load %arg1[%c0_30, %78, %c0_31, %c0_32] : memref<1x16x8x32xf32, #tpu.memory_space<vmem>>, vector<1x1x8x32xf32>
    %80 = vector.shape_cast %79 : vector<1x1x8x32xf32> to vector<8x32xf32>
    %81 = tpu.concatenate %74, %67, %77, %80 in 0 : vector<8x32xf32>, vector<8x32xf32>, vector<8x32xf32>, vector<8x32xf32> -> vector<32x32xf32>
    %cst_33 = arith.constant dense<0.000000e+00> : vector<32x32xf32>
    %82 = tpu.matmul %0, %81, %cst_33 {dimension_numbers = #tpu.dot_dimension_numbers<[1], [0], [0], [1], [0, 0, 1, 1], [], []>} : vector<32x32xf32>, vector<32x32xf32>, vector<32x32xf32> -> vector<32x32xf32>
    %83 = arith.addf %82, %3 : vector<32x32xf32>
    %84 = arith.negf %83 : vector<32x32xf32>
    %85 = math.exp %84 : vector<32x32xf32>
    %cst_34 = arith.constant 1.000000e+00 : f32
    %86 = vector.broadcast %cst_34 : f32 to vector<32x32xf32>
    %87 = arith.addf %86, %85 : vector<32x32xf32>
    %88 = arith.divf %86, %87 : vector<32x32xf32>
    %89 = vector.extract_strided_slice %88 {offsets = [0, 0], sizes = [8, 32], strides = [1, 1]} : vector<32x32xf32> to vector<8x32xf32>
    %90 = vector.extract_strided_slice %88 {offsets = [8, 0], sizes = [8, 32], strides = [1, 1]} : vector<32x32xf32> to vector<8x32xf32>
    %91 = vector.extract_strided_slice %88 {offsets = [16, 0], sizes = [8, 32], strides = [1, 1]} : vector<32x32xf32> to vector<8x32xf32>
    %92 = vector.extract_strided_slice %88 {offsets = [24, 0], sizes = [8, 32], strides = [1, 1]} : vector<32x32xf32> to vector<8x32xf32>
    %93 = arith.mulf %91, %65 : vector<8x32xf32>
    %94 = arith.mulf %89, %90 : vector<8x32xf32>
    %95 = arith.addf %93, %94 : vector<8x32xf32>
    %96 = math.tanh %95 : vector<8x32xf32>
    %97 = arith.mulf %92, %96 : vector<8x32xf32>
    %c0_35 = arith.constant 0 : index
    %98 = arith.index_cast %c1_i32_25 : i32 to index
    %c0_36 = arith.constant 0 : index
    %c0_37 = arith.constant 0 : index
    %99 = vector.load %arg4[%c0_35, %98, %c0_36, %c0_37] : memref<1x16x8x32xf32, #tpu.memory_space<vmem>>, vector<1x1x8x32xf32>
    %100 = vector.shape_cast %99 : vector<1x1x8x32xf32> to vector<8x32xf32>
    %101 = vector.shape_cast %97 : vector<8x32xf32> to vector<1x1x8x32xf32>
    tpu.vector_store %arg4[%c0_35, %98, %c0_36, %c0_37], %101 {strides = array<i32>} : memref<1x16x8x32xf32, #tpu.memory_space<vmem>>, vector<1x1x8x32xf32>,
    %c2_i32 = arith.constant 2 : i32
    %c1_i32_38 = arith.constant 1 : i32
    %102 = tpu.dynamic_rotate %97 by %c1_i32_38 dim 1 : vector<8x32xf32>, i32 -> vector<8x32xf32>
    %cst_39 = arith.constant 0.000000e+00 : f32
    %103 = vector.broadcast %cst_39 : f32 to vector<8x32xf32>
    %104 = arith.select %22, %102, %103 : vector<8x32xi1>, vector<8x32xf32>
    %c31_i32_40 = arith.constant 31 : i32
    %105 = tpu.dynamic_rotate %97 by %c31_i32_40 dim 1 : vector<8x32xf32>, i32 -> vector<8x32xf32>
    %cst_41 = arith.constant 0.000000e+00 : f32
    %106 = vector.broadcast %cst_41 : f32 to vector<8x32xf32>
    %107 = arith.select %40, %105, %106 : vector<8x32xi1>, vector<8x32xf32>
    %c0_42 = arith.constant 0 : index
    %108 = arith.index_cast %c2_i32 : i32 to index
    %c0_43 = arith.constant 0 : index
    %c0_44 = arith.constant 0 : index
    %109 = vector.load %arg1[%c0_42, %108, %c0_43, %c0_44] : memref<1x16x8x32xf32, #tpu.memory_space<vmem>>, vector<1x1x8x32xf32>
    %110 = vector.shape_cast %109 : vector<1x1x8x32xf32> to vector<8x32xf32>
    %111 = tpu.concatenate %104, %97, %107, %110 in 0 : vector<8x32xf32>, vector<8x32xf32>, vector<8x32xf32>, vector<8x32xf32> -> vector<32x32xf32>
    %cst_45 = arith.constant dense<0.000000e+00> : vector<32x32xf32>
    %112 = tpu.matmul %0, %111, %cst_45 {dimension_numbers = #tpu.dot_dimension_numbers<[1], [0], [0], [1], [0, 0, 1, 1], [], []>} : vector<32x32xf32>, vector<32x32xf32>, vector<32x32xf32> -> vector<32x32xf32>
    %113 = arith.addf %112, %3 : vector<32x32xf32>
    %114 = arith.negf %113 : vector<32x32xf32>
    %115 = math.exp %114 : vector<32x32xf32>
    %cst_46 = arith.constant 1.000000e+00 : f32
    %116 = vector.broadcast %cst_46 : f32 to vector<32x32xf32>
    %117 = arith.addf %116, %115 : vector<32x32xf32>
    %118 = arith.divf %116, %117 : vector<32x32xf32>
    %119 = vector.extract_strided_slice %118 {offsets = [0, 0], sizes = [8, 32], strides = [1, 1]} : vector<32x32xf32> to vector<8x32xf32>
    %120 = vector.extract_strided_slice %118 {offsets = [8, 0], sizes = [8, 32], strides = [1, 1]} : vector<32x32xf32> to vector<8x32xf32>
    %121 = vector.extract_strided_slice %118 {offsets = [16, 0], sizes = [8, 32], strides = [1, 1]} : vector<32x32xf32> to vector<8x32xf32>
    %122 = vector.extract_strided_slice %118 {offsets = [24, 0], sizes = [8, 32], strides = [1, 1]} : vector<32x32xf32> to vector<8x32xf32>
    %123 = arith.mulf %121, %95 : vector<8x32xf32>
    %124 = arith.mulf %119, %120 : vector<8x32xf32>
    %125 = arith.addf %123, %124 : vector<8x32xf32>
    %126 = math.tanh %125 : vector<8x32xf32>
    %127 = arith.mulf %122, %126 : vector<8x32xf32>
    %c0_47 = arith.constant 0 : index
    %128 = arith.index_cast %c2_i32 : i32 to index
    %c0_48 = arith.constant 0 : index
    %c0_49 = arith.constant 0 : index
    %129 = vector.load %arg4[%c0_47, %128, %c0_48, %c0_49] : memref<1x16x8x32xf32, #tpu.memory_space<vmem>>, vector<1x1x8x32xf32>
    %130 = vector.shape_cast %129 : vector<1x1x8x32xf32> to vector<8x32xf32>
    %131 = vector.shape_cast %127 : vector<8x32xf32> to vector<1x1x8x32xf32>
    tpu.vector_store %arg4[%c0_47, %128, %c0_48, %c0_49], %131 {strides = array<i32>} : memref<1x16x8x32xf32, #tpu.memory_space<vmem>>, vector<1x1x8x32xf32>,
    %c3_i32 = arith.constant 3 : i32
    %c1_i32_50 = arith.constant 1 : i32
    %132 = tpu.dynamic_rotate %127 by %c1_i32_50 dim 1 : vector<8x32xf32>, i32 -> vector<8x32xf32>
    %cst_51 = arith.constant 0.000000e+00 : f32
    %133 = vector.broadcast %cst_51 : f32 to vector<8x32xf32>
    %134 = arith.select %22, %132, %133 : vector<8x32xi1>, vector<8x32xf32>
    %c31_i32_52 = arith.constant 31 : i32
    %135 = tpu.dynamic_rotate %127 by %c31_i32_52 dim 1 : vector<8x32xf32>, i32 -> vector<8x32xf32>
    %cst_53 = arith.constant 0.000000e+00 : f32
    %136 = vector.broadcast %cst_53 : f32 to vector<8x32xf32>
    %137 = arith.select %40, %135, %136 : vector<8x32xi1>, vector<8x32xf32>
    %c0_54 = arith.constant 0 : index
    %138 = arith.index_cast %c3_i32 : i32 to index
    %c0_55 = arith.constant 0 : index
    %c0_56 = arith.constant 0 : index
    %139 = vector.load %arg1[%c0_54, %138, %c0_55, %c0_56] : memref<1x16x8x32xf32, #tpu.memory_space<vmem>>, vector<1x1x8x32xf32>
    %140 = vector.shape_cast %139 : vector<1x1x8x32xf32> to vector<8x32xf32>
    %141 = tpu.concatenate %134, %127, %137, %140 in 0 : vector<8x32xf32>, vector<8x32xf32>, vector<8x32xf32>, vector<8x32xf32> -> vector<32x32xf32>
    %cst_57 = arith.constant dense<0.000000e+00> : vector<32x32xf32>
    %142 = tpu.matmul %0, %141, %cst_57 {dimension_numbers = #tpu.dot_dimension_numbers<[1], [0], [0], [1], [0, 0, 1, 1], [], []>} : vector<32x32xf32>, vector<32x32xf32>, vector<32x32xf32> -> vector<32x32xf32>
    %143 = arith.addf %142, %3 : vector<32x32xf32>
    %144 = arith.negf %143 : vector<32x32xf32>
    %145 = math.exp %144 : vector<32x32xf32>
    %cst_58 = arith.constant 1.000000e+00 : f32
    %146 = vector.broadcast %cst_58 : f32 to vector<32x32xf32>
    %147 = arith.addf %146, %145 : vector<32x32xf32>
    %148 = arith.divf %146, %147 : vector<32x32xf32>
    %149 = vector.extract_strided_slice %148 {offsets = [0, 0], sizes = [8, 32], strides = [1, 1]} : vector<32x32xf32> to vector<8x32xf32>
    %150 = vector.extract_strided_slice %148 {offsets = [8, 0], sizes = [8, 32], strides = [1, 1]} : vector<32x32xf32> to vector<8x32xf32>
    %151 = vector.extract_strided_slice %148 {offsets = [16, 0], sizes = [8, 32], strides = [1, 1]} : vector<32x32xf32> to vector<8x32xf32>
    %152 = vector.extract_strided_slice %148 {offsets = [24, 0], sizes = [8, 32], strides = [1, 1]} : vector<32x32xf32> to vector<8x32xf32>
    %153 = arith.mulf %151, %125 : vector<8x32xf32>
    %154 = arith.mulf %149, %150 : vector<8x32xf32>
    %155 = arith.addf %153, %154 : vector<8x32xf32>
    %156 = math.tanh %155 : vector<8x32xf32>
    %157 = arith.mulf %152, %156 : vector<8x32xf32>
    %c0_59 = arith.constant 0 : index
    %158 = arith.index_cast %c3_i32 : i32 to index
    %c0_60 = arith.constant 0 : index
    %c0_61 = arith.constant 0 : index
    %159 = vector.load %arg4[%c0_59, %158, %c0_60, %c0_61] : memref<1x16x8x32xf32, #tpu.memory_space<vmem>>, vector<1x1x8x32xf32>
    %160 = vector.shape_cast %159 : vector<1x1x8x32xf32> to vector<8x32xf32>
    %161 = vector.shape_cast %157 : vector<8x32xf32> to vector<1x1x8x32xf32>
    tpu.vector_store %arg4[%c0_59, %158, %c0_60, %c0_61], %161 {strides = array<i32>} : memref<1x16x8x32xf32, #tpu.memory_space<vmem>>, vector<1x1x8x32xf32>,
    %c4_i32 = arith.constant 4 : i32
    %c1_i32_62 = arith.constant 1 : i32
    %162 = tpu.dynamic_rotate %157 by %c1_i32_62 dim 1 : vector<8x32xf32>, i32 -> vector<8x32xf32>
    %cst_63 = arith.constant 0.000000e+00 : f32
    %163 = vector.broadcast %cst_63 : f32 to vector<8x32xf32>
    %164 = arith.select %22, %162, %163 : vector<8x32xi1>, vector<8x32xf32>
    %c31_i32_64 = arith.constant 31 : i32
    %165 = tpu.dynamic_rotate %157 by %c31_i32_64 dim 1 : vector<8x32xf32>, i32 -> vector<8x32xf32>
    %cst_65 = arith.constant 0.000000e+00 : f32
    %166 = vector.broadcast %cst_65 : f32 to vector<8x32xf32>
    %167 = arith.select %40, %165, %166 : vector<8x32xi1>, vector<8x32xf32>
    %c0_66 = arith.constant 0 : index
    %168 = arith.index_cast %c4_i32 : i32 to index
    %c0_67 = arith.constant 0 : index
    %c0_68 = arith.constant 0 : index
    %169 = vector.load %arg1[%c0_66, %168, %c0_67, %c0_68] : memref<1x16x8x32xf32, #tpu.memory_space<vmem>>, vector<1x1x8x32xf32>
    %170 = vector.shape_cast %169 : vector<1x1x8x32xf32> to vector<8x32xf32>
    %171 = tpu.concatenate %164, %157, %167, %170 in 0 : vector<8x32xf32>, vector<8x32xf32>, vector<8x32xf32>, vector<8x32xf32> -> vector<32x32xf32>
    %cst_69 = arith.constant dense<0.000000e+00> : vector<32x32xf32>
    %172 = tpu.matmul %0, %171, %cst_69 {dimension_numbers = #tpu.dot_dimension_numbers<[1], [0], [0], [1], [0, 0, 1, 1], [], []>} : vector<32x32xf32>, vector<32x32xf32>, vector<32x32xf32> -> vector<32x32xf32>
    %173 = arith.addf %172, %3 : vector<32x32xf32>
    %174 = arith.negf %173 : vector<32x32xf32>
    %175 = math.exp %174 : vector<32x32xf32>
    %cst_70 = arith.constant 1.000000e+00 : f32
    %176 = vector.broadcast %cst_70 : f32 to vector<32x32xf32>
    %177 = arith.addf %176, %175 : vector<32x32xf32>
    %178 = arith.divf %176, %177 : vector<32x32xf32>
    %179 = vector.extract_strided_slice %178 {offsets = [0, 0], sizes = [8, 32], strides = [1, 1]} : vector<32x32xf32> to vector<8x32xf32>
    %180 = vector.extract_strided_slice %178 {offsets = [8, 0], sizes = [8, 32], strides = [1, 1]} : vector<32x32xf32> to vector<8x32xf32>
    %181 = vector.extract_strided_slice %178 {offsets = [16, 0], sizes = [8, 32], strides = [1, 1]} : vector<32x32xf32> to vector<8x32xf32>
    %182 = vector.extract_strided_slice %178 {offsets = [24, 0], sizes = [8, 32], strides = [1, 1]} : vector<32x32xf32> to vector<8x32xf32>
    %183 = arith.mulf %181, %155 : vector<8x32xf32>
    %184 = arith.mulf %179, %180 : vector<8x32xf32>
    %185 = arith.addf %183, %184 : vector<8x32xf32>
    %186 = math.tanh %185 : vector<8x32xf32>
    %187 = arith.mulf %182, %186 : vector<8x32xf32>
    %c0_71 = arith.constant 0 : index
    %188 = arith.index_cast %c4_i32 : i32 to index
    %c0_72 = arith.constant 0 : index
    %c0_73 = arith.constant 0 : index
    %189 = vector.load %arg4[%c0_71, %188, %c0_72, %c0_73] : memref<1x16x8x32xf32, #tpu.memory_space<vmem>>, vector<1x1x8x32xf32>
    %190 = vector.shape_cast %189 : vector<1x1x8x32xf32> to vector<8x32xf32>
    %191 = vector.shape_cast %187 : vector<8x32xf32> to vector<1x1x8x32xf32>
    tpu.vector_store %arg4[%c0_71, %188, %c0_72, %c0_73], %191 {strides = array<i32>} : memref<1x16x8x32xf32, #tpu.memory_space<vmem>>, vector<1x1x8x32xf32>,
    %c5_i32 = arith.constant 5 : i32
    %c1_i32_74 = arith.constant 1 : i32
    %192 = tpu.dynamic_rotate %187 by %c1_i32_74 dim 1 : vector<8x32xf32>, i32 -> vector<8x32xf32>
    %cst_75 = arith.constant 0.000000e+00 : f32
    %193 = vector.broadcast %cst_75 : f32 to vector<8x32xf32>
    %194 = arith.select %22, %192, %193 : vector<8x32xi1>, vector<8x32xf32>
    %c31_i32_76 = arith.constant 31 : i32
    %195 = tpu.dynamic_rotate %187 by %c31_i32_76 dim 1 : vector<8x32xf32>, i32 -> vector<8x32xf32>
    %cst_77 = arith.constant 0.000000e+00 : f32
    %196 = vector.broadcast %cst_77 : f32 to vector<8x32xf32>
    %197 = arith.select %40, %195, %196 : vector<8x32xi1>, vector<8x32xf32>
    %c0_78 = arith.constant 0 : index
    %198 = arith.index_cast %c5_i32 : i32 to index
    %c0_79 = arith.constant 0 : index
    %c0_80 = arith.constant 0 : index
    %199 = vector.load %arg1[%c0_78, %198, %c0_79, %c0_80] : memref<1x16x8x32xf32, #tpu.memory_space<vmem>>, vector<1x1x8x32xf32>
    %200 = vector.shape_cast %199 : vector<1x1x8x32xf32> to vector<8x32xf32>
    %201 = tpu.concatenate %194, %187, %197, %200 in 0 : vector<8x32xf32>, vector<8x32xf32>, vector<8x32xf32>, vector<8x32xf32> -> vector<32x32xf32>
    %cst_81 = arith.constant dense<0.000000e+00> : vector<32x32xf32>
    %202 = tpu.matmul %0, %201, %cst_81 {dimension_numbers = #tpu.dot_dimension_numbers<[1], [0], [0], [1], [0, 0, 1, 1], [], []>} : vector<32x32xf32>, vector<32x32xf32>, vector<32x32xf32> -> vector<32x32xf32>
    %203 = arith.addf %202, %3 : vector<32x32xf32>
    %204 = arith.negf %203 : vector<32x32xf32>
    %205 = math.exp %204 : vector<32x32xf32>
    %cst_82 = arith.constant 1.000000e+00 : f32
    %206 = vector.broadcast %cst_82 : f32 to vector<32x32xf32>
    %207 = arith.addf %206, %205 : vector<32x32xf32>
    %208 = arith.divf %206, %207 : vector<32x32xf32>
    %209 = vector.extract_strided_slice %208 {offsets = [0, 0], sizes = [8, 32], strides = [1, 1]} : vector<32x32xf32> to vector<8x32xf32>
    %210 = vector.extract_strided_slice %208 {offsets = [8, 0], sizes = [8, 32], strides = [1, 1]} : vector<32x32xf32> to vector<8x32xf32>
    %211 = vector.extract_strided_slice %208 {offsets = [16, 0], sizes = [8, 32], strides = [1, 1]} : vector<32x32xf32> to vector<8x32xf32>
    %212 = vector.extract_strided_slice %208 {offsets = [24, 0], sizes = [8, 32], strides = [1, 1]} : vector<32x32xf32> to vector<8x32xf32>
    %213 = arith.mulf %211, %185 : vector<8x32xf32>
    %214 = arith.mulf %209, %210 : vector<8x32xf32>
    %215 = arith.addf %213, %214 : vector<8x32xf32>
    %216 = math.tanh %215 : vector<8x32xf32>
    %217 = arith.mulf %212, %216 : vector<8x32xf32>
    %c0_83 = arith.constant 0 : index
    %218 = arith.index_cast %c5_i32 : i32 to index
    %c0_84 = arith.constant 0 : index
    %c0_85 = arith.constant 0 : index
    %219 = vector.load %arg4[%c0_83, %218, %c0_84, %c0_85] : memref<1x16x8x32xf32, #tpu.memory_space<vmem>>, vector<1x1x8x32xf32>
    %220 = vector.shape_cast %219 : vector<1x1x8x32xf32> to vector<8x32xf32>
    %221 = vector.shape_cast %217 : vector<8x32xf32> to vector<1x1x8x32xf32>
    tpu.vector_store %arg4[%c0_83, %218, %c0_84, %c0_85], %221 {strides = array<i32>} : memref<1x16x8x32xf32, #tpu.memory_space<vmem>>, vector<1x1x8x32xf32>,
    %c6_i32 = arith.constant 6 : i32
    %c1_i32_86 = arith.constant 1 : i32
    %222 = tpu.dynamic_rotate %217 by %c1_i32_86 dim 1 : vector<8x32xf32>, i32 -> vector<8x32xf32>
    %cst_87 = arith.constant 0.000000e+00 : f32
    %223 = vector.broadcast %cst_87 : f32 to vector<8x32xf32>
    %224 = arith.select %22, %222, %223 : vector<8x32xi1>, vector<8x32xf32>
    %c31_i32_88 = arith.constant 31 : i32
    %225 = tpu.dynamic_rotate %217 by %c31_i32_88 dim 1 : vector<8x32xf32>, i32 -> vector<8x32xf32>
    %cst_89 = arith.constant 0.000000e+00 : f32
    %226 = vector.broadcast %cst_89 : f32 to vector<8x32xf32>
    %227 = arith.select %40, %225, %226 : vector<8x32xi1>, vector<8x32xf32>
    %c0_90 = arith.constant 0 : index
    %228 = arith.index_cast %c6_i32 : i32 to index
    %c0_91 = arith.constant 0 : index
    %c0_92 = arith.constant 0 : index
    %229 = vector.load %arg1[%c0_90, %228, %c0_91, %c0_92] : memref<1x16x8x32xf32, #tpu.memory_space<vmem>>, vector<1x1x8x32xf32>
    %230 = vector.shape_cast %229 : vector<1x1x8x32xf32> to vector<8x32xf32>
    %231 = tpu.concatenate %224, %217, %227, %230 in 0 : vector<8x32xf32>, vector<8x32xf32>, vector<8x32xf32>, vector<8x32xf32> -> vector<32x32xf32>
    %cst_93 = arith.constant dense<0.000000e+00> : vector<32x32xf32>
    %232 = tpu.matmul %0, %231, %cst_93 {dimension_numbers = #tpu.dot_dimension_numbers<[1], [0], [0], [1], [0, 0, 1, 1], [], []>} : vector<32x32xf32>, vector<32x32xf32>, vector<32x32xf32> -> vector<32x32xf32>
    %233 = arith.addf %232, %3 : vector<32x32xf32>
    %234 = arith.negf %233 : vector<32x32xf32>
    %235 = math.exp %234 : vector<32x32xf32>
    %cst_94 = arith.constant 1.000000e+00 : f32
    %236 = vector.broadcast %cst_94 : f32 to vector<32x32xf32>
    %237 = arith.addf %236, %235 : vector<32x32xf32>
    %238 = arith.divf %236, %237 : vector<32x32xf32>
    %239 = vector.extract_strided_slice %238 {offsets = [0, 0], sizes = [8, 32], strides = [1, 1]} : vector<32x32xf32> to vector<8x32xf32>
    %240 = vector.extract_strided_slice %238 {offsets = [8, 0], sizes = [8, 32], strides = [1, 1]} : vector<32x32xf32> to vector<8x32xf32>
    %241 = vector.extract_strided_slice %238 {offsets = [16, 0], sizes = [8, 32], strides = [1, 1]} : vector<32x32xf32> to vector<8x32xf32>
    %242 = vector.extract_strided_slice %238 {offsets = [24, 0], sizes = [8, 32], strides = [1, 1]} : vector<32x32xf32> to vector<8x32xf32>
    %243 = arith.mulf %241, %215 : vector<8x32xf32>
    %244 = arith.mulf %239, %240 : vector<8x32xf32>
    %245 = arith.addf %243, %244 : vector<8x32xf32>
    %246 = math.tanh %245 : vector<8x32xf32>
    %247 = arith.mulf %242, %246 : vector<8x32xf32>
    %c0_95 = arith.constant 0 : index
    %248 = arith.index_cast %c6_i32 : i32 to index
    %c0_96 = arith.constant 0 : index
    %c0_97 = arith.constant 0 : index
    %249 = vector.load %arg4[%c0_95, %248, %c0_96, %c0_97] : memref<1x16x8x32xf32, #tpu.memory_space<vmem>>, vector<1x1x8x32xf32>
    %250 = vector.shape_cast %249 : vector<1x1x8x32xf32> to vector<8x32xf32>
    %251 = vector.shape_cast %247 : vector<8x32xf32> to vector<1x1x8x32xf32>
    tpu.vector_store %arg4[%c0_95, %248, %c0_96, %c0_97], %251 {strides = array<i32>} : memref<1x16x8x32xf32, #tpu.memory_space<vmem>>, vector<1x1x8x32xf32>,
    %c7_i32 = arith.constant 7 : i32
    %c1_i32_98 = arith.constant 1 : i32
    %252 = tpu.dynamic_rotate %247 by %c1_i32_98 dim 1 : vector<8x32xf32>, i32 -> vector<8x32xf32>
    %cst_99 = arith.constant 0.000000e+00 : f32
    %253 = vector.broadcast %cst_99 : f32 to vector<8x32xf32>
    %254 = arith.select %22, %252, %253 : vector<8x32xi1>, vector<8x32xf32>
    %c31_i32_100 = arith.constant 31 : i32
    %255 = tpu.dynamic_rotate %247 by %c31_i32_100 dim 1 : vector<8x32xf32>, i32 -> vector<8x32xf32>
    %cst_101 = arith.constant 0.000000e+00 : f32
    %256 = vector.broadcast %cst_101 : f32 to vector<8x32xf32>
    %257 = arith.select %40, %255, %256 : vector<8x32xi1>, vector<8x32xf32>
    %c0_102 = arith.constant 0 : index
    %258 = arith.index_cast %c7_i32 : i32 to index
    %c0_103 = arith.constant 0 : index
    %c0_104 = arith.constant 0 : index
    %259 = vector.load %arg1[%c0_102, %258, %c0_103, %c0_104] : memref<1x16x8x32xf32, #tpu.memory_space<vmem>>, vector<1x1x8x32xf32>
    %260 = vector.shape_cast %259 : vector<1x1x8x32xf32> to vector<8x32xf32>
    %261 = tpu.concatenate %254, %247, %257, %260 in 0 : vector<8x32xf32>, vector<8x32xf32>, vector<8x32xf32>, vector<8x32xf32> -> vector<32x32xf32>
    %cst_105 = arith.constant dense<0.000000e+00> : vector<32x32xf32>
    %262 = tpu.matmul %0, %261, %cst_105 {dimension_numbers = #tpu.dot_dimension_numbers<[1], [0], [0], [1], [0, 0, 1, 1], [], []>} : vector<32x32xf32>, vector<32x32xf32>, vector<32x32xf32> -> vector<32x32xf32>
    %263 = arith.addf %262, %3 : vector<32x32xf32>
    %264 = arith.negf %263 : vector<32x32xf32>
    %265 = math.exp %264 : vector<32x32xf32>
    %cst_106 = arith.constant 1.000000e+00 : f32
    %266 = vector.broadcast %cst_106 : f32 to vector<32x32xf32>
    %267 = arith.addf %266, %265 : vector<32x32xf32>
    %268 = arith.divf %266, %267 : vector<32x32xf32>
    %269 = vector.extract_strided_slice %268 {offsets = [0, 0], sizes = [8, 32], strides = [1, 1]} : vector<32x32xf32> to vector<8x32xf32>
    %270 = vector.extract_strided_slice %268 {offsets = [8, 0], sizes = [8, 32], strides = [1, 1]} : vector<32x32xf32> to vector<8x32xf32>
    %271 = vector.extract_strided_slice %268 {offsets = [16, 0], sizes = [8, 32], strides = [1, 1]} : vector<32x32xf32> to vector<8x32xf32>
    %272 = vector.extract_strided_slice %268 {offsets = [24, 0], sizes = [8, 32], strides = [1, 1]} : vector<32x32xf32> to vector<8x32xf32>
    %273 = arith.mulf %271, %245 : vector<8x32xf32>
    %274 = arith.mulf %269, %270 : vector<8x32xf32>
    %275 = arith.addf %273, %274 : vector<8x32xf32>
    %276 = math.tanh %275 : vector<8x32xf32>
    %277 = arith.mulf %272, %276 : vector<8x32xf32>
    %c0_107 = arith.constant 0 : index
    %278 = arith.index_cast %c7_i32 : i32 to index
    %c0_108 = arith.constant 0 : index
    %c0_109 = arith.constant 0 : index
    %279 = vector.load %arg4[%c0_107, %278, %c0_108, %c0_109] : memref<1x16x8x32xf32, #tpu.memory_space<vmem>>, vector<1x1x8x32xf32>
    %280 = vector.shape_cast %279 : vector<1x1x8x32xf32> to vector<8x32xf32>
    %281 = vector.shape_cast %277 : vector<8x32xf32> to vector<1x1x8x32xf32>
    tpu.vector_store %arg4[%c0_107, %278, %c0_108, %c0_109], %281 {strides = array<i32>} : memref<1x16x8x32xf32, #tpu.memory_space<vmem>>, vector<1x1x8x32xf32>,
    %c8_i32 = arith.constant 8 : i32
    %c1_i32_110 = arith.constant 1 : i32
    %282 = tpu.dynamic_rotate %277 by %c1_i32_110 dim 1 : vector<8x32xf32>, i32 -> vector<8x32xf32>
    %cst_111 = arith.constant 0.000000e+00 : f32
    %283 = vector.broadcast %cst_111 : f32 to vector<8x32xf32>
    %284 = arith.select %22, %282, %283 : vector<8x32xi1>, vector<8x32xf32>
    %c31_i32_112 = arith.constant 31 : i32
    %285 = tpu.dynamic_rotate %277 by %c31_i32_112 dim 1 : vector<8x32xf32>, i32 -> vector<8x32xf32>
    %cst_113 = arith.constant 0.000000e+00 : f32
    %286 = vector.broadcast %cst_113 : f32 to vector<8x32xf32>
    %287 = arith.select %40, %285, %286 : vector<8x32xi1>, vector<8x32xf32>
    %c0_114 = arith.constant 0 : index
    %288 = arith.index_cast %c8_i32 : i32 to index
    %c0_115 = arith.constant 0 : index
    %c0_116 = arith.constant 0 : index
    %289 = vector.load %arg1[%c0_114, %288, %c0_115, %c0_116] : memref<1x16x8x32xf32, #tpu.memory_space<vmem>>, vector<1x1x8x32xf32>
    %290 = vector.shape_cast %289 : vector<1x1x8x32xf32> to vector<8x32xf32>
    %291 = tpu.concatenate %284, %277, %287, %290 in 0 : vector<8x32xf32>, vector<8x32xf32>, vector<8x32xf32>, vector<8x32xf32> -> vector<32x32xf32>
    %cst_117 = arith.constant dense<0.000000e+00> : vector<32x32xf32>
    %292 = tpu.matmul %0, %291, %cst_117 {dimension_numbers = #tpu.dot_dimension_numbers<[1], [0], [0], [1], [0, 0, 1, 1], [], []>} : vector<32x32xf32>, vector<32x32xf32>, vector<32x32xf32> -> vector<32x32xf32>
    %293 = arith.addf %292, %3 : vector<32x32xf32>
    %294 = arith.negf %293 : vector<32x32xf32>
    %295 = math.exp %294 : vector<32x32xf32>
    %cst_118 = arith.constant 1.000000e+00 : f32
    %296 = vector.broadcast %cst_118 : f32 to vector<32x32xf32>
    %297 = arith.addf %296, %295 : vector<32x32xf32>
    %298 = arith.divf %296, %297 : vector<32x32xf32>
    %299 = vector.extract_strided_slice %298 {offsets = [0, 0], sizes = [8, 32], strides = [1, 1]} : vector<32x32xf32> to vector<8x32xf32>
    %300 = vector.extract_strided_slice %298 {offsets = [8, 0], sizes = [8, 32], strides = [1, 1]} : vector<32x32xf32> to vector<8x32xf32>
    %301 = vector.extract_strided_slice %298 {offsets = [16, 0], sizes = [8, 32], strides = [1, 1]} : vector<32x32xf32> to vector<8x32xf32>
    %302 = vector.extract_strided_slice %298 {offsets = [24, 0], sizes = [8, 32], strides = [1, 1]} : vector<32x32xf32> to vector<8x32xf32>
    %303 = arith.mulf %301, %275 : vector<8x32xf32>
    %304 = arith.mulf %299, %300 : vector<8x32xf32>
    %305 = arith.addf %303, %304 : vector<8x32xf32>
    %306 = math.tanh %305 : vector<8x32xf32>
    %307 = arith.mulf %302, %306 : vector<8x32xf32>
    %c0_119 = arith.constant 0 : index
    %308 = arith.index_cast %c8_i32 : i32 to index
    %c0_120 = arith.constant 0 : index
    %c0_121 = arith.constant 0 : index
    %309 = vector.load %arg4[%c0_119, %308, %c0_120, %c0_121] : memref<1x16x8x32xf32, #tpu.memory_space<vmem>>, vector<1x1x8x32xf32>
    %310 = vector.shape_cast %309 : vector<1x1x8x32xf32> to vector<8x32xf32>
    %311 = vector.shape_cast %307 : vector<8x32xf32> to vector<1x1x8x32xf32>
    tpu.vector_store %arg4[%c0_119, %308, %c0_120, %c0_121], %311 {strides = array<i32>} : memref<1x16x8x32xf32, #tpu.memory_space<vmem>>, vector<1x1x8x32xf32>,
    %c9_i32 = arith.constant 9 : i32
    %c1_i32_122 = arith.constant 1 : i32
    %312 = tpu.dynamic_rotate %307 by %c1_i32_122 dim 1 : vector<8x32xf32>, i32 -> vector<8x32xf32>
    %cst_123 = arith.constant 0.000000e+00 : f32
    %313 = vector.broadcast %cst_123 : f32 to vector<8x32xf32>
    %314 = arith.select %22, %312, %313 : vector<8x32xi1>, vector<8x32xf32>
    %c31_i32_124 = arith.constant 31 : i32
    %315 = tpu.dynamic_rotate %307 by %c31_i32_124 dim 1 : vector<8x32xf32>, i32 -> vector<8x32xf32>
    %cst_125 = arith.constant 0.000000e+00 : f32
    %316 = vector.broadcast %cst_125 : f32 to vector<8x32xf32>
    %317 = arith.select %40, %315, %316 : vector<8x32xi1>, vector<8x32xf32>
    %c0_126 = arith.constant 0 : index
    %318 = arith.index_cast %c9_i32 : i32 to index
    %c0_127 = arith.constant 0 : index
    %c0_128 = arith.constant 0 : index
    %319 = vector.load %arg1[%c0_126, %318, %c0_127, %c0_128] : memref<1x16x8x32xf32, #tpu.memory_space<vmem>>, vector<1x1x8x32xf32>
    %320 = vector.shape_cast %319 : vector<1x1x8x32xf32> to vector<8x32xf32>
    %321 = tpu.concatenate %314, %307, %317, %320 in 0 : vector<8x32xf32>, vector<8x32xf32>, vector<8x32xf32>, vector<8x32xf32> -> vector<32x32xf32>
    %cst_129 = arith.constant dense<0.000000e+00> : vector<32x32xf32>
    %322 = tpu.matmul %0, %321, %cst_129 {dimension_numbers = #tpu.dot_dimension_numbers<[1], [0], [0], [1], [0, 0, 1, 1], [], []>} : vector<32x32xf32>, vector<32x32xf32>, vector<32x32xf32> -> vector<32x32xf32>
    %323 = arith.addf %322, %3 : vector<32x32xf32>
    %324 = arith.negf %323 : vector<32x32xf32>
    %325 = math.exp %324 : vector<32x32xf32>
    %cst_130 = arith.constant 1.000000e+00 : f32
    %326 = vector.broadcast %cst_130 : f32 to vector<32x32xf32>
    %327 = arith.addf %326, %325 : vector<32x32xf32>
    %328 = arith.divf %326, %327 : vector<32x32xf32>
    %329 = vector.extract_strided_slice %328 {offsets = [0, 0], sizes = [8, 32], strides = [1, 1]} : vector<32x32xf32> to vector<8x32xf32>
    %330 = vector.extract_strided_slice %328 {offsets = [8, 0], sizes = [8, 32], strides = [1, 1]} : vector<32x32xf32> to vector<8x32xf32>
    %331 = vector.extract_strided_slice %328 {offsets = [16, 0], sizes = [8, 32], strides = [1, 1]} : vector<32x32xf32> to vector<8x32xf32>
    %332 = vector.extract_strided_slice %328 {offsets = [24, 0], sizes = [8, 32], strides = [1, 1]} : vector<32x32xf32> to vector<8x32xf32>
    %333 = arith.mulf %331, %305 : vector<8x32xf32>
    %334 = arith.mulf %329, %330 : vector<8x32xf32>
    %335 = arith.addf %333, %334 : vector<8x32xf32>
    %336 = math.tanh %335 : vector<8x32xf32>
    %337 = arith.mulf %332, %336 : vector<8x32xf32>
    %c0_131 = arith.constant 0 : index
    %338 = arith.index_cast %c9_i32 : i32 to index
    %c0_132 = arith.constant 0 : index
    %c0_133 = arith.constant 0 : index
    %339 = vector.load %arg4[%c0_131, %338, %c0_132, %c0_133] : memref<1x16x8x32xf32, #tpu.memory_space<vmem>>, vector<1x1x8x32xf32>
    %340 = vector.shape_cast %339 : vector<1x1x8x32xf32> to vector<8x32xf32>
    %341 = vector.shape_cast %337 : vector<8x32xf32> to vector<1x1x8x32xf32>
    tpu.vector_store %arg4[%c0_131, %338, %c0_132, %c0_133], %341 {strides = array<i32>} : memref<1x16x8x32xf32, #tpu.memory_space<vmem>>, vector<1x1x8x32xf32>,
    %c10_i32 = arith.constant 10 : i32
    %c1_i32_134 = arith.constant 1 : i32
    %342 = tpu.dynamic_rotate %337 by %c1_i32_134 dim 1 : vector<8x32xf32>, i32 -> vector<8x32xf32>
    %cst_135 = arith.constant 0.000000e+00 : f32
    %343 = vector.broadcast %cst_135 : f32 to vector<8x32xf32>
    %344 = arith.select %22, %342, %343 : vector<8x32xi1>, vector<8x32xf32>
    %c31_i32_136 = arith.constant 31 : i32
    %345 = tpu.dynamic_rotate %337 by %c31_i32_136 dim 1 : vector<8x32xf32>, i32 -> vector<8x32xf32>
    %cst_137 = arith.constant 0.000000e+00 : f32
    %346 = vector.broadcast %cst_137 : f32 to vector<8x32xf32>
    %347 = arith.select %40, %345, %346 : vector<8x32xi1>, vector<8x32xf32>
    %c0_138 = arith.constant 0 : index
    %348 = arith.index_cast %c10_i32 : i32 to index
    %c0_139 = arith.constant 0 : index
    %c0_140 = arith.constant 0 : index
    %349 = vector.load %arg1[%c0_138, %348, %c0_139, %c0_140] : memref<1x16x8x32xf32, #tpu.memory_space<vmem>>, vector<1x1x8x32xf32>
    %350 = vector.shape_cast %349 : vector<1x1x8x32xf32> to vector<8x32xf32>
    %351 = tpu.concatenate %344, %337, %347, %350 in 0 : vector<8x32xf32>, vector<8x32xf32>, vector<8x32xf32>, vector<8x32xf32> -> vector<32x32xf32>
    %cst_141 = arith.constant dense<0.000000e+00> : vector<32x32xf32>
    %352 = tpu.matmul %0, %351, %cst_141 {dimension_numbers = #tpu.dot_dimension_numbers<[1], [0], [0], [1], [0, 0, 1, 1], [], []>} : vector<32x32xf32>, vector<32x32xf32>, vector<32x32xf32> -> vector<32x32xf32>
    %353 = arith.addf %352, %3 : vector<32x32xf32>
    %354 = arith.negf %353 : vector<32x32xf32>
    %355 = math.exp %354 : vector<32x32xf32>
    %cst_142 = arith.constant 1.000000e+00 : f32
    %356 = vector.broadcast %cst_142 : f32 to vector<32x32xf32>
    %357 = arith.addf %356, %355 : vector<32x32xf32>
    %358 = arith.divf %356, %357 : vector<32x32xf32>
    %359 = vector.extract_strided_slice %358 {offsets = [0, 0], sizes = [8, 32], strides = [1, 1]} : vector<32x32xf32> to vector<8x32xf32>
    %360 = vector.extract_strided_slice %358 {offsets = [8, 0], sizes = [8, 32], strides = [1, 1]} : vector<32x32xf32> to vector<8x32xf32>
    %361 = vector.extract_strided_slice %358 {offsets = [16, 0], sizes = [8, 32], strides = [1, 1]} : vector<32x32xf32> to vector<8x32xf32>
    %362 = vector.extract_strided_slice %358 {offsets = [24, 0], sizes = [8, 32], strides = [1, 1]} : vector<32x32xf32> to vector<8x32xf32>
    %363 = arith.mulf %361, %335 : vector<8x32xf32>
    %364 = arith.mulf %359, %360 : vector<8x32xf32>
    %365 = arith.addf %363, %364 : vector<8x32xf32>
    %366 = math.tanh %365 : vector<8x32xf32>
    %367 = arith.mulf %362, %366 : vector<8x32xf32>
    %c0_143 = arith.constant 0 : index
    %368 = arith.index_cast %c10_i32 : i32 to index
    %c0_144 = arith.constant 0 : index
    %c0_145 = arith.constant 0 : index
    %369 = vector.load %arg4[%c0_143, %368, %c0_144, %c0_145] : memref<1x16x8x32xf32, #tpu.memory_space<vmem>>, vector<1x1x8x32xf32>
    %370 = vector.shape_cast %369 : vector<1x1x8x32xf32> to vector<8x32xf32>
    %371 = vector.shape_cast %367 : vector<8x32xf32> to vector<1x1x8x32xf32>
    tpu.vector_store %arg4[%c0_143, %368, %c0_144, %c0_145], %371 {strides = array<i32>} : memref<1x16x8x32xf32, #tpu.memory_space<vmem>>, vector<1x1x8x32xf32>,
    %c11_i32 = arith.constant 11 : i32
    %c1_i32_146 = arith.constant 1 : i32
    %372 = tpu.dynamic_rotate %367 by %c1_i32_146 dim 1 : vector<8x32xf32>, i32 -> vector<8x32xf32>
    %cst_147 = arith.constant 0.000000e+00 : f32
    %373 = vector.broadcast %cst_147 : f32 to vector<8x32xf32>
    %374 = arith.select %22, %372, %373 : vector<8x32xi1>, vector<8x32xf32>
    %c31_i32_148 = arith.constant 31 : i32
    %375 = tpu.dynamic_rotate %367 by %c31_i32_148 dim 1 : vector<8x32xf32>, i32 -> vector<8x32xf32>
    %cst_149 = arith.constant 0.000000e+00 : f32
    %376 = vector.broadcast %cst_149 : f32 to vector<8x32xf32>
    %377 = arith.select %40, %375, %376 : vector<8x32xi1>, vector<8x32xf32>
    %c0_150 = arith.constant 0 : index
    %378 = arith.index_cast %c11_i32 : i32 to index
    %c0_151 = arith.constant 0 : index
    %c0_152 = arith.constant 0 : index
    %379 = vector.load %arg1[%c0_150, %378, %c0_151, %c0_152] : memref<1x16x8x32xf32, #tpu.memory_space<vmem>>, vector<1x1x8x32xf32>
    %380 = vector.shape_cast %379 : vector<1x1x8x32xf32> to vector<8x32xf32>
    %381 = tpu.concatenate %374, %367, %377, %380 in 0 : vector<8x32xf32>, vector<8x32xf32>, vector<8x32xf32>, vector<8x32xf32> -> vector<32x32xf32>
    %cst_153 = arith.constant dense<0.000000e+00> : vector<32x32xf32>
    %382 = tpu.matmul %0, %381, %cst_153 {dimension_numbers = #tpu.dot_dimension_numbers<[1], [0], [0], [1], [0, 0, 1, 1], [], []>} : vector<32x32xf32>, vector<32x32xf32>, vector<32x32xf32> -> vector<32x32xf32>
    %383 = arith.addf %382, %3 : vector<32x32xf32>
    %384 = arith.negf %383 : vector<32x32xf32>
    %385 = math.exp %384 : vector<32x32xf32>
    %cst_154 = arith.constant 1.000000e+00 : f32
    %386 = vector.broadcast %cst_154 : f32 to vector<32x32xf32>
    %387 = arith.addf %386, %385 : vector<32x32xf32>
    %388 = arith.divf %386, %387 : vector<32x32xf32>
    %389 = vector.extract_strided_slice %388 {offsets = [0, 0], sizes = [8, 32], strides = [1, 1]} : vector<32x32xf32> to vector<8x32xf32>
    %390 = vector.extract_strided_slice %388 {offsets = [8, 0], sizes = [8, 32], strides = [1, 1]} : vector<32x32xf32> to vector<8x32xf32>
    %391 = vector.extract_strided_slice %388 {offsets = [16, 0], sizes = [8, 32], strides = [1, 1]} : vector<32x32xf32> to vector<8x32xf32>
    %392 = vector.extract_strided_slice %388 {offsets = [24, 0], sizes = [8, 32], strides = [1, 1]} : vector<32x32xf32> to vector<8x32xf32>
    %393 = arith.mulf %391, %365 : vector<8x32xf32>
    %394 = arith.mulf %389, %390 : vector<8x32xf32>
    %395 = arith.addf %393, %394 : vector<8x32xf32>
    %396 = math.tanh %395 : vector<8x32xf32>
    %397 = arith.mulf %392, %396 : vector<8x32xf32>
    %c0_155 = arith.constant 0 : index
    %398 = arith.index_cast %c11_i32 : i32 to index
    %c0_156 = arith.constant 0 : index
    %c0_157 = arith.constant 0 : index
    %399 = vector.load %arg4[%c0_155, %398, %c0_156, %c0_157] : memref<1x16x8x32xf32, #tpu.memory_space<vmem>>, vector<1x1x8x32xf32>
    %400 = vector.shape_cast %399 : vector<1x1x8x32xf32> to vector<8x32xf32>
    %401 = vector.shape_cast %397 : vector<8x32xf32> to vector<1x1x8x32xf32>
    tpu.vector_store %arg4[%c0_155, %398, %c0_156, %c0_157], %401 {strides = array<i32>} : memref<1x16x8x32xf32, #tpu.memory_space<vmem>>, vector<1x1x8x32xf32>,
    %c12_i32 = arith.constant 12 : i32
    %c1_i32_158 = arith.constant 1 : i32
    %402 = tpu.dynamic_rotate %397 by %c1_i32_158 dim 1 : vector<8x32xf32>, i32 -> vector<8x32xf32>
    %cst_159 = arith.constant 0.000000e+00 : f32
    %403 = vector.broadcast %cst_159 : f32 to vector<8x32xf32>
    %404 = arith.select %22, %402, %403 : vector<8x32xi1>, vector<8x32xf32>
    %c31_i32_160 = arith.constant 31 : i32
    %405 = tpu.dynamic_rotate %397 by %c31_i32_160 dim 1 : vector<8x32xf32>, i32 -> vector<8x32xf32>
    %cst_161 = arith.constant 0.000000e+00 : f32
    %406 = vector.broadcast %cst_161 : f32 to vector<8x32xf32>
    %407 = arith.select %40, %405, %406 : vector<8x32xi1>, vector<8x32xf32>
    %c0_162 = arith.constant 0 : index
    %408 = arith.index_cast %c12_i32 : i32 to index
    %c0_163 = arith.constant 0 : index
    %c0_164 = arith.constant 0 : index
    %409 = vector.load %arg1[%c0_162, %408, %c0_163, %c0_164] : memref<1x16x8x32xf32, #tpu.memory_space<vmem>>, vector<1x1x8x32xf32>
    %410 = vector.shape_cast %409 : vector<1x1x8x32xf32> to vector<8x32xf32>
    %411 = tpu.concatenate %404, %397, %407, %410 in 0 : vector<8x32xf32>, vector<8x32xf32>, vector<8x32xf32>, vector<8x32xf32> -> vector<32x32xf32>
    %cst_165 = arith.constant dense<0.000000e+00> : vector<32x32xf32>
    %412 = tpu.matmul %0, %411, %cst_165 {dimension_numbers = #tpu.dot_dimension_numbers<[1], [0], [0], [1], [0, 0, 1, 1], [], []>} : vector<32x32xf32>, vector<32x32xf32>, vector<32x32xf32> -> vector<32x32xf32>
    %413 = arith.addf %412, %3 : vector<32x32xf32>
    %414 = arith.negf %413 : vector<32x32xf32>
    %415 = math.exp %414 : vector<32x32xf32>
    %cst_166 = arith.constant 1.000000e+00 : f32
    %416 = vector.broadcast %cst_166 : f32 to vector<32x32xf32>
    %417 = arith.addf %416, %415 : vector<32x32xf32>
    %418 = arith.divf %416, %417 : vector<32x32xf32>
    %419 = vector.extract_strided_slice %418 {offsets = [0, 0], sizes = [8, 32], strides = [1, 1]} : vector<32x32xf32> to vector<8x32xf32>
    %420 = vector.extract_strided_slice %418 {offsets = [8, 0], sizes = [8, 32], strides = [1, 1]} : vector<32x32xf32> to vector<8x32xf32>
    %421 = vector.extract_strided_slice %418 {offsets = [16, 0], sizes = [8, 32], strides = [1, 1]} : vector<32x32xf32> to vector<8x32xf32>
    %422 = vector.extract_strided_slice %418 {offsets = [24, 0], sizes = [8, 32], strides = [1, 1]} : vector<32x32xf32> to vector<8x32xf32>
    %423 = arith.mulf %421, %395 : vector<8x32xf32>
    %424 = arith.mulf %419, %420 : vector<8x32xf32>
    %425 = arith.addf %423, %424 : vector<8x32xf32>
    %426 = math.tanh %425 : vector<8x32xf32>
    %427 = arith.mulf %422, %426 : vector<8x32xf32>
    %c0_167 = arith.constant 0 : index
    %428 = arith.index_cast %c12_i32 : i32 to index
    %c0_168 = arith.constant 0 : index
    %c0_169 = arith.constant 0 : index
    %429 = vector.load %arg4[%c0_167, %428, %c0_168, %c0_169] : memref<1x16x8x32xf32, #tpu.memory_space<vmem>>, vector<1x1x8x32xf32>
    %430 = vector.shape_cast %429 : vector<1x1x8x32xf32> to vector<8x32xf32>
    %431 = vector.shape_cast %427 : vector<8x32xf32> to vector<1x1x8x32xf32>
    tpu.vector_store %arg4[%c0_167, %428, %c0_168, %c0_169], %431 {strides = array<i32>} : memref<1x16x8x32xf32, #tpu.memory_space<vmem>>, vector<1x1x8x32xf32>,
    %c13_i32 = arith.constant 13 : i32
    %c1_i32_170 = arith.constant 1 : i32
    %432 = tpu.dynamic_rotate %427 by %c1_i32_170 dim 1 : vector<8x32xf32>, i32 -> vector<8x32xf32>
    %cst_171 = arith.constant 0.000000e+00 : f32
    %433 = vector.broadcast %cst_171 : f32 to vector<8x32xf32>
    %434 = arith.select %22, %432, %433 : vector<8x32xi1>, vector<8x32xf32>
    %c31_i32_172 = arith.constant 31 : i32
    %435 = tpu.dynamic_rotate %427 by %c31_i32_172 dim 1 : vector<8x32xf32>, i32 -> vector<8x32xf32>
    %cst_173 = arith.constant 0.000000e+00 : f32
    %436 = vector.broadcast %cst_173 : f32 to vector<8x32xf32>
    %437 = arith.select %40, %435, %436 : vector<8x32xi1>, vector<8x32xf32>
    %c0_174 = arith.constant 0 : index
    %438 = arith.index_cast %c13_i32 : i32 to index
    %c0_175 = arith.constant 0 : index
    %c0_176 = arith.constant 0 : index
    %439 = vector.load %arg1[%c0_174, %438, %c0_175, %c0_176] : memref<1x16x8x32xf32, #tpu.memory_space<vmem>>, vector<1x1x8x32xf32>
    %440 = vector.shape_cast %439 : vector<1x1x8x32xf32> to vector<8x32xf32>
    %441 = tpu.concatenate %434, %427, %437, %440 in 0 : vector<8x32xf32>, vector<8x32xf32>, vector<8x32xf32>, vector<8x32xf32> -> vector<32x32xf32>
    %cst_177 = arith.constant dense<0.000000e+00> : vector<32x32xf32>
    %442 = tpu.matmul %0, %441, %cst_177 {dimension_numbers = #tpu.dot_dimension_numbers<[1], [0], [0], [1], [0, 0, 1, 1], [], []>} : vector<32x32xf32>, vector<32x32xf32>, vector<32x32xf32> -> vector<32x32xf32>
    %443 = arith.addf %442, %3 : vector<32x32xf32>
    %444 = arith.negf %443 : vector<32x32xf32>
    %445 = math.exp %444 : vector<32x32xf32>
    %cst_178 = arith.constant 1.000000e+00 : f32
    %446 = vector.broadcast %cst_178 : f32 to vector<32x32xf32>
    %447 = arith.addf %446, %445 : vector<32x32xf32>
    %448 = arith.divf %446, %447 : vector<32x32xf32>
    %449 = vector.extract_strided_slice %448 {offsets = [0, 0], sizes = [8, 32], strides = [1, 1]} : vector<32x32xf32> to vector<8x32xf32>
    %450 = vector.extract_strided_slice %448 {offsets = [8, 0], sizes = [8, 32], strides = [1, 1]} : vector<32x32xf32> to vector<8x32xf32>
    %451 = vector.extract_strided_slice %448 {offsets = [16, 0], sizes = [8, 32], strides = [1, 1]} : vector<32x32xf32> to vector<8x32xf32>
    %452 = vector.extract_strided_slice %448 {offsets = [24, 0], sizes = [8, 32], strides = [1, 1]} : vector<32x32xf32> to vector<8x32xf32>
    %453 = arith.mulf %451, %425 : vector<8x32xf32>
    %454 = arith.mulf %449, %450 : vector<8x32xf32>
    %455 = arith.addf %453, %454 : vector<8x32xf32>
    %456 = math.tanh %455 : vector<8x32xf32>
    %457 = arith.mulf %452, %456 : vector<8x32xf32>
    %c0_179 = arith.constant 0 : index
    %458 = arith.index_cast %c13_i32 : i32 to index
    %c0_180 = arith.constant 0 : index
    %c0_181 = arith.constant 0 : index
    %459 = vector.load %arg4[%c0_179, %458, %c0_180, %c0_181] : memref<1x16x8x32xf32, #tpu.memory_space<vmem>>, vector<1x1x8x32xf32>
    %460 = vector.shape_cast %459 : vector<1x1x8x32xf32> to vector<8x32xf32>
    %461 = vector.shape_cast %457 : vector<8x32xf32> to vector<1x1x8x32xf32>
    tpu.vector_store %arg4[%c0_179, %458, %c0_180, %c0_181], %461 {strides = array<i32>} : memref<1x16x8x32xf32, #tpu.memory_space<vmem>>, vector<1x1x8x32xf32>,
    %c14_i32 = arith.constant 14 : i32
    %c1_i32_182 = arith.constant 1 : i32
    %462 = tpu.dynamic_rotate %457 by %c1_i32_182 dim 1 : vector<8x32xf32>, i32 -> vector<8x32xf32>
    %cst_183 = arith.constant 0.000000e+00 : f32
    %463 = vector.broadcast %cst_183 : f32 to vector<8x32xf32>
    %464 = arith.select %22, %462, %463 : vector<8x32xi1>, vector<8x32xf32>
    %c31_i32_184 = arith.constant 31 : i32
    %465 = tpu.dynamic_rotate %457 by %c31_i32_184 dim 1 : vector<8x32xf32>, i32 -> vector<8x32xf32>
    %cst_185 = arith.constant 0.000000e+00 : f32
    %466 = vector.broadcast %cst_185 : f32 to vector<8x32xf32>
    %467 = arith.select %40, %465, %466 : vector<8x32xi1>, vector<8x32xf32>
    %c0_186 = arith.constant 0 : index
    %468 = arith.index_cast %c14_i32 : i32 to index
    %c0_187 = arith.constant 0 : index
    %c0_188 = arith.constant 0 : index
    %469 = vector.load %arg1[%c0_186, %468, %c0_187, %c0_188] : memref<1x16x8x32xf32, #tpu.memory_space<vmem>>, vector<1x1x8x32xf32>
    %470 = vector.shape_cast %469 : vector<1x1x8x32xf32> to vector<8x32xf32>
    %471 = tpu.concatenate %464, %457, %467, %470 in 0 : vector<8x32xf32>, vector<8x32xf32>, vector<8x32xf32>, vector<8x32xf32> -> vector<32x32xf32>
    %cst_189 = arith.constant dense<0.000000e+00> : vector<32x32xf32>
    %472 = tpu.matmul %0, %471, %cst_189 {dimension_numbers = #tpu.dot_dimension_numbers<[1], [0], [0], [1], [0, 0, 1, 1], [], []>} : vector<32x32xf32>, vector<32x32xf32>, vector<32x32xf32> -> vector<32x32xf32>
    %473 = arith.addf %472, %3 : vector<32x32xf32>
    %474 = arith.negf %473 : vector<32x32xf32>
    %475 = math.exp %474 : vector<32x32xf32>
    %cst_190 = arith.constant 1.000000e+00 : f32
    %476 = vector.broadcast %cst_190 : f32 to vector<32x32xf32>
    %477 = arith.addf %476, %475 : vector<32x32xf32>
    %478 = arith.divf %476, %477 : vector<32x32xf32>
    %479 = vector.extract_strided_slice %478 {offsets = [0, 0], sizes = [8, 32], strides = [1, 1]} : vector<32x32xf32> to vector<8x32xf32>
    %480 = vector.extract_strided_slice %478 {offsets = [8, 0], sizes = [8, 32], strides = [1, 1]} : vector<32x32xf32> to vector<8x32xf32>
    %481 = vector.extract_strided_slice %478 {offsets = [16, 0], sizes = [8, 32], strides = [1, 1]} : vector<32x32xf32> to vector<8x32xf32>
    %482 = vector.extract_strided_slice %478 {offsets = [24, 0], sizes = [8, 32], strides = [1, 1]} : vector<32x32xf32> to vector<8x32xf32>
    %483 = arith.mulf %481, %455 : vector<8x32xf32>
    %484 = arith.mulf %479, %480 : vector<8x32xf32>
    %485 = arith.addf %483, %484 : vector<8x32xf32>
    %486 = math.tanh %485 : vector<8x32xf32>
    %487 = arith.mulf %482, %486 : vector<8x32xf32>
    %c0_191 = arith.constant 0 : index
    %488 = arith.index_cast %c14_i32 : i32 to index
    %c0_192 = arith.constant 0 : index
    %c0_193 = arith.constant 0 : index
    %489 = vector.load %arg4[%c0_191, %488, %c0_192, %c0_193] : memref<1x16x8x32xf32, #tpu.memory_space<vmem>>, vector<1x1x8x32xf32>
    %490 = vector.shape_cast %489 : vector<1x1x8x32xf32> to vector<8x32xf32>
    %491 = vector.shape_cast %487 : vector<8x32xf32> to vector<1x1x8x32xf32>
    tpu.vector_store %arg4[%c0_191, %488, %c0_192, %c0_193], %491 {strides = array<i32>} : memref<1x16x8x32xf32, #tpu.memory_space<vmem>>, vector<1x1x8x32xf32>,
    %c15_i32_194 = arith.constant 15 : i32
    %c1_i32_195 = arith.constant 1 : i32
    %492 = tpu.dynamic_rotate %487 by %c1_i32_195 dim 1 : vector<8x32xf32>, i32 -> vector<8x32xf32>
    %cst_196 = arith.constant 0.000000e+00 : f32
    %493 = vector.broadcast %cst_196 : f32 to vector<8x32xf32>
    %494 = arith.select %22, %492, %493 : vector<8x32xi1>, vector<8x32xf32>
    %c31_i32_197 = arith.constant 31 : i32
    %495 = tpu.dynamic_rotate %487 by %c31_i32_197 dim 1 : vector<8x32xf32>, i32 -> vector<8x32xf32>
    %cst_198 = arith.constant 0.000000e+00 : f32
    %496 = vector.broadcast %cst_198 : f32 to vector<8x32xf32>
    %497 = arith.select %40, %495, %496 : vector<8x32xi1>, vector<8x32xf32>
    %c0_199 = arith.constant 0 : index
    %498 = arith.index_cast %c15_i32_194 : i32 to index
    %c0_200 = arith.constant 0 : index
    %c0_201 = arith.constant 0 : index
    %499 = vector.load %arg1[%c0_199, %498, %c0_200, %c0_201] : memref<1x16x8x32xf32, #tpu.memory_space<vmem>>, vector<1x1x8x32xf32>
    %500 = vector.shape_cast %499 : vector<1x1x8x32xf32> to vector<8x32xf32>
    %501 = tpu.concatenate %494, %487, %497, %500 in 0 : vector<8x32xf32>, vector<8x32xf32>, vector<8x32xf32>, vector<8x32xf32> -> vector<32x32xf32>
    %cst_202 = arith.constant dense<0.000000e+00> : vector<32x32xf32>
    %502 = tpu.matmul %0, %501, %cst_202 {dimension_numbers = #tpu.dot_dimension_numbers<[1], [0], [0], [1], [0, 0, 1, 1], [], []>} : vector<32x32xf32>, vector<32x32xf32>, vector<32x32xf32> -> vector<32x32xf32>
    %503 = arith.addf %502, %3 : vector<32x32xf32>
    %504 = arith.negf %503 : vector<32x32xf32>
    %505 = math.exp %504 : vector<32x32xf32>
    %cst_203 = arith.constant 1.000000e+00 : f32
    %506 = vector.broadcast %cst_203 : f32 to vector<32x32xf32>
    %507 = arith.addf %506, %505 : vector<32x32xf32>
    %508 = arith.divf %506, %507 : vector<32x32xf32>
    %509 = vector.extract_strided_slice %508 {offsets = [0, 0], sizes = [8, 32], strides = [1, 1]} : vector<32x32xf32> to vector<8x32xf32>
    %510 = vector.extract_strided_slice %508 {offsets = [8, 0], sizes = [8, 32], strides = [1, 1]} : vector<32x32xf32> to vector<8x32xf32>
    %511 = vector.extract_strided_slice %508 {offsets = [16, 0], sizes = [8, 32], strides = [1, 1]} : vector<32x32xf32> to vector<8x32xf32>
    %512 = vector.extract_strided_slice %508 {offsets = [24, 0], sizes = [8, 32], strides = [1, 1]} : vector<32x32xf32> to vector<8x32xf32>
    %513 = arith.mulf %511, %485 : vector<8x32xf32>
    %514 = arith.mulf %509, %510 : vector<8x32xf32>
    %515 = arith.addf %513, %514 : vector<8x32xf32>
    %516 = math.tanh %515 : vector<8x32xf32>
    %517 = arith.mulf %512, %516 : vector<8x32xf32>
    %c0_204 = arith.constant 0 : index
    %518 = arith.index_cast %c15_i32_194 : i32 to index
    %c0_205 = arith.constant 0 : index
    %c0_206 = arith.constant 0 : index
    %519 = vector.load %arg4[%c0_204, %518, %c0_205, %c0_206] : memref<1x16x8x32xf32, #tpu.memory_space<vmem>>, vector<1x1x8x32xf32>
    %520 = vector.shape_cast %519 : vector<1x1x8x32xf32> to vector<8x32xf32>
    %521 = vector.shape_cast %517 : vector<8x32xf32> to vector<1x1x8x32xf32>
    tpu.vector_store %arg4[%c0_204, %518, %c0_205, %c0_206], %521 {strides = array<i32>} : memref<1x16x8x32xf32, #tpu.memory_space<vmem>>, vector<1x1x8x32xf32>,
    %c16_i32_207 = arith.constant 16 : i32
    return
  }
  func.func @transform_0(%arg0: i32) -> (i32, i32, i32, i32) {
    %c0_i32 = arith.constant 0 : i32
    %c0_i32_0 = arith.constant 0 : i32
    %c0_i32_1 = arith.constant 0 : i32
    %c0_i32_2 = arith.constant 0 : i32
    return %arg0, %c0_i32, %c0_i32_0, %c0_i32_1 : i32, i32, i32, i32
  }
  func.func @transform_1(%arg0: i32) -> (i32, i32) {
    %c0_i32 = arith.constant 0 : i32
    %c0_i32_0 = arith.constant 0 : i32
    %c0_i32_1 = arith.constant 0 : i32
    return %c0_i32, %c0_i32_0 : i32, i32
  }
  func.func @transform_2(%arg0: i32) -> (i32, i32) {
    %c0_i32 = arith.constant 0 : i32
    %c0_i32_0 = arith.constant 0 : i32
    %c0_i32_1 = arith.constant 0 : i32
    return %c0_i32, %c0_i32_0 : i32, i32
  }
  func.func @transform_3(%arg0: i32) -> (i32, i32, i32, i32) {
    %c0_i32 = arith.constant 0 : i32
    %c0_i32_0 = arith.constant 0 : i32
    %c0_i32_1 = arith.constant 0 : i32
    %c0_i32_2 = arith.constant 0 : i32
    return %arg0, %c0_i32, %c0_i32_0, %c0_i32_1 : i32, i32, i32, i32
  }
}

</mosaic_0001>

<bundles_post_ra>
// kernel: tpu_custom_call.1
= control target key start
LH: loop header
LB: loop body
LE: loop exit
PB: predicated region body
PF: predicated region fallthrough
CT: control target
= control target key end

     0   :  { %8 = vsyncpa [#allocation3], 0  ;;  %s3846_s0 = inlined_call_operand.hbm [shape: f32[1,16,8,32], index: 0, kind: input, shape index: {}]   ;;  %s3847_s1 = inlined_call_operand.vmem [shape: f32[32,32], index: 1, kind: input, shape index: {}]   ;;  %s3848_s2 = inlined_call_operand.vmem [shape: f32[32,1], index: 2, kind: input, shape index: {}]   ;;  %s3849_s3 = inlined_call_operand.hbm [shape: f32[1,16,8,32], index: 3, kind: output, shape index: {}]  }
   0x1   :  { %9 = vsyncpa [#allocation4], 0  ;;  %s3286_s12 = smov [#allocation2]   ;;  %s3238_s16 = scalar_lea.hbm %s3846_s0, 2048 }
   0x2   :  { %s15_s13 = sshll.u32 %s3286_s12, 4  ;;  %p3239_p0 = scmp.ne.s32.totalorder %s3846_s0, %s3238_s16  ;;  %s16_s13 = int_to_ptr.vmem [resolvable:$true] %s15_s13 }
   0x3   :  { %p3242_p1 = scmp.lt.u32.totalorder %s3238_s16, %s3846_s0 }
   0x5   :  { %p3244_p2 = pnand %p3242_p1, %p3239_p0 }
   0x7   :  { %3247 = shalt.err (!%p3244_p2)
}
   0x8   :  { %s3248_s21 = scalar_lea.vmem %s16_s13, 2048  ;;  %p3253_p4 = scmp.lt.s32.totalorder %s16_s13, %s16_s13 }
   0x9   :  { %p3249_p3 = scmp.ne.s32.totalorder %s16_s13, %s3248_s21  ;;  %p3254_p5 = scmp.lt.s32.totalorder %s3248_s21, %s3248_s21 }
   0xb   :  { %p3255_p6 = por %p3254_p5, %p3253_p4 }
   0xd   :  { %p3256_p7 = pnand %p3255_p6, %p3249_p3 }
   0xf   :  { %3259 = shalt.err (!%p3256_p7)
}
  0x10   :  { %s3287_s22 = smov 128   ;;  %s3288_s23 = smov 8  }
  0x11   :  { %21 = dma.hbm_to_vmem [thread:$0]  %s3846_s0, 2048, %s16_s13, [#allocation3], %s3287_s22, %s3287_s22, %s3288_s23  }
  0x12   :  { %3282 = dma.done.wait [#allocation3], 2048  }
  0x13   :  { %3283 = vsyncadd [#allocation3], 4294965248  ;;  %v3289_v0 = vmov 0.0   ;;  %s3290_s26 = smov 32   ;;  %vm73_vm0 = vcmask 1047808   ;;  %v3337_v3 = vld [vmem:[%s3847_s1] sm:$0xff]  ;;  %v57_v11 = vlaneseq }
  0x14   :  { %74 = vrot.lane.b32.xlu0 %v3289_v0, %s3290_s26  ;;  %vm90_vm1 = vcmask 261120   ;;  %s3291_s0 = smov 97   ;;  %v33_v6 = vld [vmem:[%s3848_s2] sm:$0xff]  ;;  %v3292_v7 = vmov 0   ;;  %s3293_s4 = smov 127   ;;  %v36_v8 = vld [vmem:[%s3848_s2 + $0x18] sm:$0xff] }
  0x15   :  { %2526 = vmatprep.mubr.msk.f32.mxu0 %vm90_vm1, %v3337_v3  ;;  %2540 = vmatprep.mubr.msk.f32.mxu1 %vm90_vm1, %v3337_v3  ;;  %v34_v9 = vld [vmem:[%s3848_s2 + $0x8] sm:$0xff]  ;;  %v35_v10 = vld [vmem:[%s3848_s2 + $0x10] sm:$0xff]  ;;  %v58_v12 = vand.u32 127, %v57_v11  ;;  %vm3294_vm3 = vmmov 1   ;;  %v89_v17 = vld [vmem:[#allocation2] sm:$0xff] }
  0x16   :  { %2945 = vset.pattern.permute.xlu1 %v3292_v7  ;;  %2944 = vset.pattern.permute.xlu0 %v3292_v7  ;;  %v3377_v21 = vld [vmem:[%s3847_s1 + $0x8] sm:$0xff]  ;;  %v3382_v22 = vld [vmem:[%s3847_s1 + $0x10] sm:$0xff]  ;;  %v3391_v23 = vld [vmem:[%s3847_s1 + $0x18] sm:$0xff] }
  0x17   :  { %v63_v13 = vand.u32 15, %v58_v12  ;;  %v234_v61 = vld [vmem:[#allocation2 + $0x8] sm:$0xff] }
  0x19   :  { %vm71_vm2 = vcmp.ne.s32.totalorder %v63_v13, 0  ;;  %vm72_vm5 = vcmp.ne.s32.totalorder %v63_v13, 15 }
  0x1a   :  { %vm3358_vm4 = vmpackc.low %vm3294_vm3, %vm71_vm2 }
  0x1b   :  { %vm3366_vm6 = vmpackc.low %vm3294_vm3, %vm72_vm5 }
  0x86   :  { %v75_v1 = vpop.permute.xlu0 %74 }
  0x87   :  { %v76_v2 = vsel %vm73_vm0, %v75_v1, 0.0 }
  0x88   :  { %77 = vrot.lane.b32.xlu0 %v76_v2, %s3290_s26 }
  0x8c   :  { %39 = vperm.xlu0 %2944, %v33_v6  }
  0x90   :  { %54 = vperm.xlu0 %2944, %v36_v8  }
  0xfa   :  { %v78_v4 = vpop.permute.xlu0 %77 }
  0xfb   :  { %v79_v5 = vsel %vm73_vm0, %v78_v4, 0.0 }
  0xfc   :  { %81 = vrot.lane.b32.xlu1 %v79_v5, %s3291_s0 }
 0x100   :  { %85 = vrot.lane.b32.xlu1 %v79_v5, %s3293_s4 }
 0x104   :  { %44 = vperm.xlu1 %2945, %v34_v9  }
 0x108   :  { %49 = vperm.xlu1 %2945, %v35_v10  }
 0x10b   :  { %v3399_v25 = vpop.permute.xlu0 %39 }
 0x10f   :  { %v3406_v37 = vpop.permute.xlu0 %54 }
 0x16e   :  { %v82_v14 = vpop.permute.xlu1 %81 }
 0x16f   :  { %v2742_v16 = vpack.c.bf16 %v3289_v0, %v82_v14 }
 0x171   :  { %2744 = vmatprep.subr.msk.bf16.mxu0 %vm3358_vm4, %v2742_v16 }
 0x172   :  { %v86_v18 = vpop.permute.xlu1 %85  ;;  %2747 = vmatpush3.bf16.msk.msra.mxu0 %vm3358_vm4, %v2742_v16 }
 0x173   :  { %v2748_v20 = vpack.c.bf16 %v89_v17, %v86_v18 }
 0x175   :  { %2750 = vmatprep.subr.msk.bf16.mxu0 %vm3366_vm6, %v2748_v20 }
 0x176   :  { %2753 = vmatpush3.bf16.msk.msra.mxu0 %vm3366_vm6, %v2748_v20 }
 0x179   :  { %2527 = vmatmul.mubr.msk.f32.vlgmr.msra.gmra.mrb[0].mxu0 %vm90_vm1, %v3377_v21 }
 0x17a   :  { %2529 = vmatprep.mubr.msk.f32.mxu0 %vm90_vm1, %v3382_v22 }
 0x17d   :  { %2530 = vmatmul.mubr.msk.f32.gmra.mrb[2].mxu0 %vm90_vm1, %v3391_v23 }
 0x17e   :  { %2554 = vmatprep.mubr.msk.f32.mxu0 %vm90_vm1, %v3337_v3 }
 0x183   :  { %v3397_v24 = vpop.permute.xlu1 %44 }
 0x187   :  { %v3403_v33 = vpop.permute.xlu1 %49 }
 0x24c   :  { %v2528_v26 = vpop.f32.mrb[0].mxu0 }
 0x24d   :  { %v175_v27 = vadd.f32 %v2528_v26, %v3397_v24  ;;  %v169_v28 = vpop.f32.mrb[1].mxu0 }
 0x24e   :  { %v170_v29 = vadd.f32 %v169_v28, %v3399_v25 }
 0x24f   :  { %v2237_v30 = vmul.f32 -1.442695, %v175_v27 }
 0x250   :  { %v2236_v31 = vmul.f32 -1.442695, %v170_v29  ;;  %v2531_v32 = vpop.f32.mrb[2].mxu0 }
 0x251   :  { %2946 = vpow2.f32 %v2237_v30  ;;  %v179_v34 = vpop.f32.mrb[3].mxu0  ;;  %v185_v38 = vadd.f32 %v2531_v32, %v3406_v37 }
 0x252   :  { %2948 = vpow2.f32 %v2236_v31  ;;  %v180_v35 = vadd.f32 %v179_v34, %v3403_v33 }
 0x253   :  { %v2239_v42 = vmul.f32 -1.442695, %v185_v38 }
 0x254   :  { %v2238_v36 = vmul.f32 -1.442695, %v180_v35 }
 0x256   :  { %2950 = vpow2.f32 %v2238_v36 }
 0x25b   :  { %v2947_v39 = vpop.eup %2946 }
 0x25c   :  { %v2949_v40 = vpop.eup %2948  ;;  %v201_v41 = vadd.f32 1.0, %v2947_v39 }
 0x25d   :  { %v200_v43 = vadd.f32 1.0, %v2949_v40 }
 0x25e   :  { %2952 = vrcp.f32 %v201_v41 }
 0x25f   :  { %2954 = vrcp.f32 %v200_v43 }
 0x260   :  { %v2951_v44 = vpop.eup %2950  ;;  %2956 = vpow2.f32 %v2239_v42 }
 0x261   :  { %v202_v45 = vadd.f32 1.0, %v2951_v44 }
 0x263   :  { %2958 = vrcp.f32 %v202_v45  ;;  %v367_v45 = vld [vmem:[#allocation2 + $0x10] sm:$0xff] }
 0x268   :  { %v2953_v46 = vpop.eup %2952 }
 0x269   :  { %v2955_v47 = vpop.eup %2954 }
 0x26a   :  { %v2957_v48 = vpop.eup %2956  ;;  %v213_v49 = vmul.f32 %v2955_v47, %v2953_v46 }
 0x26b   :  { %v203_v51 = vadd.f32 1.0, %v2957_v48 }
 0x26d   :  { %v2959_v50 = vpop.eup %2958  ;;  %2960 = vrcp.f32 %v203_v51 }
 0x26e   :  { %v212_v52 = vmul.f32 0.0, %v2959_v50 }
 0x270   :  { %v214_v53 = vadd.f32 %v213_v49, %v212_v52 }
 0x272   :  { %2962 = vtanh.f32 %v214_v53 }
 0x277   :  { %v2961_v54 = vpop.eup %2960 }
 0x27c   :  { %v2963_v55 = vpop.eup %2962 }
 0x27d   :  { %v216_v56 = vmul.f32 %v2963_v55, %v2961_v54 }
 0x27f   :  { %218 = vrot.lane.b32.xlu1 %v216_v56, %s3290_s26  ;;  %217 = vst.msk [vmem:[#allocation5] sm:$0xff] %vm90_vm1, %v216_v56 }
 0x2f1   :  { %v219_v57 = vpop.permute.xlu1 %218 }
 0x2f2   :  { %v220_v58 = vsel %vm73_vm0, %v219_v57, %v216_v56 }
 0x2f3   :  { %221 = vrot.lane.b32.xlu0 %v220_v58, %s3290_s26 }
 0x365   :  { %v222_v59 = vpop.permute.xlu0 %221 }
 0x366   :  { %v223_v60 = vsel %vm73_vm0, %v222_v59, %v216_v56 }
 0x367   :  { %229 = vrot.lane.b32.xlu0 %v223_v60, %s3293_s4  ;;  %225 = vrot.lane.b32.xlu1 %v223_v60, %s3291_s0 }
 0x3d9   :  { %v230_v62 = vpop.permute.xlu0 %229  ;;  %v226_v63 = vpop.permute.xlu1 %225 }
 0x3da   :  { %v2754_v0 = vpack.c.bf16 %v216_v56, %v226_v63  ;;  %v2760_v1 = vpack.c.bf16 %v234_v61, %v230_v62 }
 0x3dc   :  { %2756 = vmatprep.subr.msk.bf16.mxu1 %vm3358_vm4, %v2754_v0 }
 0x3dd   :  { %2759 = vmatpush3.bf16.msk.msra.mxu1 %vm3358_vm4, %v2754_v0 }
 0x3de   :  { %2762 = vmatprep.subr.msk.bf16.mxu1 %vm3366_vm6, %v2760_v1 }
 0x3e1   :  { %2765 = vmatpush3.bf16.msk.msra.mxu1 %vm3366_vm6, %v2760_v1 }
 0x3e4   :  { %2541 = vmatmul.mubr.msk.f32.vlgmr.msra.gmra.mrb[0].mxu1 %vm90_vm1, %v3377_v21 }
 0x3e5   :  { %2543 = vmatprep.mubr.msk.f32.mxu1 %vm90_vm1, %v3382_v22 }
 0x3e8   :  { %2544 = vmatmul.mubr.msk.f32.gmra.mrb[2].mxu1 %vm90_vm1, %v3391_v23 }
 0x3e9   :  { %2568 = vmatprep.mubr.msk.f32.mxu1 %vm90_vm1, %v3337_v3 }
 0x4b7   :  { %v2542_v2 = vpop.f32.mrb[0].mxu1 }
 0x4b8   :  { %v307_v4 = vadd.f32 %v2542_v2, %v3397_v24  ;;  %v301_v5 = vpop.f32.mrb[1].mxu1 }
 0x4b9   :  { %v302_v6 = vadd.f32 %v301_v5, %v3399_v25 }
 0x4ba   :  { %v2247_v7 = vmul.f32 -1.442695, %v307_v4 }
 0x4bb   :  { %v2246_v8 = vmul.f32 -1.442695, %v302_v6  ;;  %v2545_v9 = vpop.f32.mrb[2].mxu1 }
 0x4bc   :  { %2964 = vpow2.f32 %v2247_v7  ;;  %v311_v10 = vpop.f32.mrb[3].mxu1  ;;  %v317_v13 = vadd.f32 %v2545_v9, %v3406_v37 }
 0x4bd   :  { %2966 = vpow2.f32 %v2246_v8  ;;  %v312_v11 = vadd.f32 %v311_v10, %v3403_v33 }
 0x4be   :  { %v2249_v18 = vmul.f32 -1.442695, %v317_v13 }
 0x4bf   :  { %v2248_v12 = vmul.f32 -1.442695, %v312_v11 }
 0x4c1   :  { %2968 = vpow2.f32 %v2248_v12 }
 0x4c6   :  { %v2965_v14 = vpop.eup %2964 }
 0x4c7   :  { %v2967_v16 = vpop.eup %2966  ;;  %v333_v17 = vadd.f32 1.0, %v2965_v14 }
 0x4c8   :  { %v332_v20 = vadd.f32 1.0, %v2967_v16 }
 0x4c9   :  { %2970 = vrcp.f32 %v333_v17 }
 0x4ca   :  { %2972 = vrcp.f32 %v332_v20 }
 0x4cb   :  { %v2969_v26 = vpop.eup %2968  ;;  %2974 = vpow2.f32 %v2249_v18 }
 0x4cc   :  { %v334_v27 = vadd.f32 1.0, %v2969_v26 }
 0x4ce   :  { %2976 = vrcp.f32 %v334_v27  ;;  %v500_v27 = vld [vmem:[#allocation2 + $0x18] sm:$0xff] }
 0x4d3   :  { %v2971_v28 = vpop.eup %2970 }
 0x4d4   :  { %v2973_v29 = vpop.eup %2972 }
 0x4d5   :  { %v2975_v30 = vpop.eup %2974  ;;  %v345_v31 = vmul.f32 %v2973_v29, %v2971_v28 }
 0x4d6   :  { %v335_v34 = vadd.f32 1.0, %v2975_v30 }
 0x4d8   :  { %v2977_v32 = vpop.eup %2976  ;;  %2978 = vrcp.f32 %v335_v34 }
 0x4d9   :  { %v344_v35 = vmul.f32 %v2977_v32, %v214_v53 }
 0x4db   :  { %v346_v36 = vadd.f32 %v345_v31, %v344_v35 }
 0x4dd   :  { %2980 = vtanh.f32 %v346_v36 }
 0x4e2   :  { %v2979_v38 = vpop.eup %2978 }
 0x4e7   :  { %v2981_v39 = vpop.eup %2980 }
 0x4e8   :  { %v348_v40 = vmul.f32 %v2981_v39, %v2979_v38 }
 0x4ea   :  { %351 = vrot.lane.b32.xlu1 %v348_v40, %s3290_s26  ;;  %350 = vst.msk [vmem:[#allocation5 + $0x8] sm:$0xff] %vm90_vm1, %v348_v40 }
 0x55c   :  { %v352_v41 = vpop.permute.xlu1 %351 }
 0x55d   :  { %v353_v42 = vsel %vm73_vm0, %v352_v41, %v348_v40 }
 0x55e   :  { %354 = vrot.lane.b32.xlu0 %v353_v42, %s3290_s26 }
 0x5d0   :  { %v355_v43 = vpop.permute.xlu0 %354 }
 0x5d1   :  { %v356_v44 = vsel %vm73_vm0, %v355_v43, %v348_v40 }
 0x5d2   :  { %362 = vrot.lane.b32.xlu0 %v356_v44, %s3293_s4  ;;  %358 = vrot.lane.b32.xlu1 %v356_v44, %s3291_s0 }
 0x644   :  { %v363_v46 = vpop.permute.xlu0 %362  ;;  %v359_v47 = vpop.permute.xlu1 %358 }
 0x645   :  { %v2766_v48 = vpack.c.bf16 %v348_v40, %v359_v47  ;;  %v2772_v49 = vpack.c.bf16 %v367_v45, %v363_v46 }
 0x647   :  { %2768 = vmatprep.subr.msk.bf16.mxu0 %vm3358_vm4, %v2766_v48 }
 0x648   :  { %2771 = vmatpush3.bf16.msk.msra.mxu0 %vm3358_vm4, %v2766_v48 }
 0x649   :  { %2774 = vmatprep.subr.msk.bf16.mxu0 %vm3366_vm6, %v2772_v49 }
 0x64c   :  { %2777 = vmatpush3.bf16.msk.msra.mxu0 %vm3366_vm6, %v2772_v49 }
 0x64f   :  { %2555 = vmatmul.mubr.msk.f32.vlgmr.msra.gmra.mrb[4].mxu0 %vm90_vm1, %v3377_v21 }
 0x650   :  { %2557 = vmatprep.mubr.msk.f32.mxu0 %vm90_vm1, %v3382_v22 }
 0x653   :  { %2558 = vmatmul.mubr.msk.f32.gmra.mrb[6].mxu0 %vm90_vm1, %v3391_v23 }
 0x654   :  { %2582 = vmatprep.mubr.msk.f32.mxu0 %vm90_vm1, %v3337_v3 }
 0x722   :  { %v2556_v50 = vpop.f32.mrb[4].mxu0 }
 0x723   :  { %v440_v51 = vadd.f32 %v2556_v50, %v3397_v24  ;;  %v434_v52 = vpop.f32.mrb[5].mxu0 }
 0x724   :  { %v435_v53 = vadd.f32 %v434_v52, %v3399_v25 }
 0x725   :  { %v2257_v54 = vmul.f32 -1.442695, %v440_v51 }
 0x726   :  { %v2256_v55 = vmul.f32 -1.442695, %v435_v53  ;;  %v2559_v56 = vpop.f32.mrb[6].mxu0 }
 0x727   :  { %2982 = vpow2.f32 %v2257_v54  ;;  %v444_v57 = vpop.f32.mrb[7].mxu0  ;;  %v450_v60 = vadd.f32 %v2559_v56, %v3406_v37 }
 0x728   :  { %2984 = vpow2.f32 %v2256_v55  ;;  %v445_v58 = vadd.f32 %v444_v57, %v3403_v33 }
 0x729   :  { %v2259_v0 = vmul.f32 -1.442695, %v450_v60 }
 0x72a   :  { %v2258_v59 = vmul.f32 -1.442695, %v445_v58 }
 0x72c   :  { %2986 = vpow2.f32 %v2258_v59 }
 0x731   :  { %v2983_v61 = vpop.eup %2982 }
 0x732   :  { %v2985_v62 = vpop.eup %2984  ;;  %v466_v63 = vadd.f32 1.0, %v2983_v61 }
 0x733   :  { %v465_v1 = vadd.f32 1.0, %v2985_v62 }
 0x734   :  { %2988 = vrcp.f32 %v466_v63 }
 0x735   :  { %2990 = vrcp.f32 %v465_v1 }
 0x736   :  { %v2987_v2 = vpop.eup %2986  ;;  %2992 = vpow2.f32 %v2259_v0 }
 0x737   :  { %v467_v4 = vadd.f32 1.0, %v2987_v2 }
 0x739   :  { %2994 = vrcp.f32 %v467_v4  ;;  %v633_v4 = vld [vmem:[#allocation2 + $0x20] sm:$0xff] }
 0x73e   :  { %v2989_v5 = vpop.eup %2988 }
 0x73f   :  { %v2991_v6 = vpop.eup %2990 }
 0x740   :  { %v2993_v7 = vpop.eup %2992  ;;  %v478_v8 = vmul.f32 %v2991_v6, %v2989_v5 }
 0x741   :  { %v468_v10 = vadd.f32 1.0, %v2993_v7 }
 0x743   :  { %v2995_v9 = vpop.eup %2994  ;;  %2996 = vrcp.f32 %v468_v10 }
 0x744   :  { %v477_v11 = vmul.f32 %v2995_v9, %v346_v36 }
 0x746   :  { %v479_v12 = vadd.f32 %v478_v8, %v477_v11 }
 0x748   :  { %2998 = vtanh.f32 %v479_v12 }
 0x74d   :  { %v2997_v13 = vpop.eup %2996 }
 0x752   :  { %v2999_v14 = vpop.eup %2998 }
 0x753   :  { %v481_v16 = vmul.f32 %v2999_v14, %v2997_v13 }
 0x755   :  { %484 = vrot.lane.b32.xlu1 %v481_v16, %s3290_s26  ;;  %483 = vst.msk [vmem:[#allocation5 + $0x10] sm:$0xff] %vm90_vm1, %v481_v16 }
 0x7c7   :  { %v485_v17 = vpop.permute.xlu1 %484 }
 0x7c8   :  { %v486_v18 = vsel %vm73_vm0, %v485_v17, %v481_v16 }
 0x7c9   :  { %487 = vrot.lane.b32.xlu0 %v486_v18, %s3290_s26 }
 0x83b   :  { %v488_v20 = vpop.permute.xlu0 %487 }
 0x83c   :  { %v489_v26 = vsel %vm73_vm0, %v488_v20, %v481_v16 }
 0x83d   :  { %495 = vrot.lane.b32.xlu0 %v489_v26, %s3293_s4  ;;  %491 = vrot.lane.b32.xlu1 %v489_v26, %s3291_s0 }
 0x8af   :  { %v496_v28 = vpop.permute.xlu0 %495  ;;  %v492_v29 = vpop.permute.xlu1 %491 }
 0x8b0   :  { %v2778_v30 = vpack.c.bf16 %v481_v16, %v492_v29  ;;  %v2784_v31 = vpack.c.bf16 %v500_v27, %v496_v28 }
 0x8b2   :  { %2780 = vmatprep.subr.msk.bf16.mxu1 %vm3358_vm4, %v2778_v30 }
 0x8b3   :  { %2783 = vmatpush3.bf16.msk.msra.mxu1 %vm3358_vm4, %v2778_v30 }
 0x8b4   :  { %2786 = vmatprep.subr.msk.bf16.mxu1 %vm3366_vm6, %v2784_v31 }
 0x8b7   :  { %2789 = vmatpush3.bf16.msk.msra.mxu1 %vm3366_vm6, %v2784_v31 }
 0x8ba   :  { %2569 = vmatmul.mubr.msk.f32.vlgmr.msra.gmra.mrb[4].mxu1 %vm90_vm1, %v3377_v21 }
 0x8bb   :  { %2571 = vmatprep.mubr.msk.f32.mxu1 %vm90_vm1, %v3382_v22 }
 0x8be   :  { %2572 = vmatmul.mubr.msk.f32.gmra.mrb[6].mxu1 %vm90_vm1, %v3391_v23 }
 0x8bf   :  { %2596 = vmatprep.mubr.msk.f32.mxu1 %vm90_vm1, %v3337_v3 }
 0x98d   :  { %v2570_v32 = vpop.f32.mrb[4].mxu1 }
 0x98e   :  { %v573_v34 = vadd.f32 %v2570_v32, %v3397_v24  ;;  %v567_v35 = vpop.f32.mrb[5].mxu1 }
 0x98f   :  { %v568_v36 = vadd.f32 %v567_v35, %v3399_v25 }
 0x990   :  { %v2267_v38 = vmul.f32 -1.442695, %v573_v34 }
 0x991   :  { %v2266_v39 = vmul.f32 -1.442695, %v568_v36  ;;  %v2573_v40 = vpop.f32.mrb[6].mxu1 }
 0x992   :  { %3000 = vpow2.f32 %v2267_v38  ;;  %v577_v41 = vpop.f32.mrb[7].mxu1  ;;  %v583_v44 = vadd.f32 %v2573_v40, %v3406_v37 }
 0x993   :  { %3002 = vpow2.f32 %v2266_v39  ;;  %v578_v42 = vadd.f32 %v577_v41, %v3403_v33 }
 0x994   :  { %v2269_v48 = vmul.f32 -1.442695, %v583_v44 }
 0x995   :  { %v2268_v43 = vmul.f32 -1.442695, %v578_v42 }
 0x997   :  { %3004 = vpow2.f32 %v2268_v43 }
 0x99c   :  { %v3001_v45 = vpop.eup %3000 }
 0x99d   :  { %v3003_v46 = vpop.eup %3002  ;;  %v599_v47 = vadd.f32 1.0, %v3001_v45 }
 0x99e   :  { %v598_v49 = vadd.f32 1.0, %v3003_v46 }
 0x99f   :  { %3006 = vrcp.f32 %v599_v47 }
 0x9a0   :  { %3008 = vrcp.f32 %v598_v49 }
 0x9a1   :  { %v3005_v50 = vpop.eup %3004  ;;  %3010 = vpow2.f32 %v2269_v48 }
 0x9a2   :  { %v600_v51 = vadd.f32 1.0, %v3005_v50 }
 0x9a4   :  { %3012 = vrcp.f32 %v600_v51  ;;  %v766_v51 = vld [vmem:[#allocation2 + $0x28] sm:$0xff] }
 0x9a9   :  { %v3007_v52 = vpop.eup %3006 }
 0x9aa   :  { %v3009_v53 = vpop.eup %3008 }
 0x9ab   :  { %v3011_v54 = vpop.eup %3010  ;;  %v611_v55 = vmul.f32 %v3009_v53, %v3007_v52 }
 0x9ac   :  { %v601_v57 = vadd.f32 1.0, %v3011_v54 }
 0x9ae   :  { %v3013_v56 = vpop.eup %3012  ;;  %3014 = vrcp.f32 %v601_v57 }
 0x9af   :  { %v610_v58 = vmul.f32 %v3013_v56, %v479_v12 }
 0x9b1   :  { %v612_v59 = vadd.f32 %v611_v55, %v610_v58 }
 0x9b3   :  { %3016 = vtanh.f32 %v612_v59 }
 0x9b8   :  { %v3015_v60 = vpop.eup %3014 }
 0x9bd   :  { %v3017_v61 = vpop.eup %3016 }
 0x9be   :  { %v614_v62 = vmul.f32 %v3017_v61, %v3015_v60 }
 0x9c0   :  { %617 = vrot.lane.b32.xlu1 %v614_v62, %s3290_s26  ;;  %616 = vst.msk [vmem:[#allocation5 + $0x18] sm:$0xff] %vm90_vm1, %v614_v62 }
 0xa32   :  { %v618_v63 = vpop.permute.xlu1 %617 }
 0xa33   :  { %v619_v0 = vsel %vm73_vm0, %v618_v63, %v614_v62 }
 0xa34   :  { %620 = vrot.lane.b32.xlu0 %v619_v0, %s3290_s26 }
 0xaa6   :  { %v621_v1 = vpop.permute.xlu0 %620 }
 0xaa7   :  { %v622_v2 = vsel %vm73_vm0, %v621_v1, %v614_v62 }
 0xaa8   :  { %628 = vrot.lane.b32.xlu0 %v622_v2, %s3293_s4  ;;  %624 = vrot.lane.b32.xlu1 %v622_v2, %s3291_s0 }
 0xb1a   :  { %v629_v5 = vpop.permute.xlu0 %628  ;;  %v625_v6 = vpop.permute.xlu1 %624 }
 0xb1b   :  { %v2790_v7 = vpack.c.bf16 %v614_v62, %v625_v6  ;;  %v2796_v8 = vpack.c.bf16 %v633_v4, %v629_v5 }
 0xb1d   :  { %2792 = vmatprep.subr.msk.bf16.mxu0 %vm3358_vm4, %v2790_v7 }
 0xb1e   :  { %2795 = vmatpush3.bf16.msk.msra.mxu0 %vm3358_vm4, %v2790_v7 }
 0xb1f   :  { %2798 = vmatprep.subr.msk.bf16.mxu0 %vm3366_vm6, %v2796_v8 }
 0xb22   :  { %2801 = vmatpush3.bf16.msk.msra.mxu0 %vm3366_vm6, %v2796_v8 }
 0xb25   :  { %2583 = vmatmul.mubr.msk.f32.vlgmr.msra.gmra.mrb[8].mxu0 %vm90_vm1, %v3377_v21 }
 0xb26   :  { %2585 = vmatprep.mubr.msk.f32.mxu0 %vm90_vm1, %v3382_v22 }
 0xb29   :  { %2586 = vmatmul.mubr.msk.f32.gmra.mrb[10].mxu0 %vm90_vm1, %v3391_v23 }
 0xb2a   :  { %2610 = vmatprep.mubr.msk.f32.mxu0 %vm90_vm1, %v3337_v3 }
 0xbf8   :  { %v2584_v9 = vpop.f32.mrb[8].mxu0 }
 0xbf9   :  { %v706_v10 = vadd.f32 %v2584_v9, %v3397_v24  ;;  %v700_v11 = vpop.f32.mrb[9].mxu0 }
 0xbfa   :  { %v701_v12 = vadd.f32 %v700_v11, %v3399_v25 }
 0xbfb   :  { %v2277_v13 = vmul.f32 -1.442695, %v706_v10 }
 0xbfc   :  { %v2276_v14 = vmul.f32 -1.442695, %v701_v12  ;;  %v2587_v16 = vpop.f32.mrb[10].mxu0 }
 0xbfd   :  { %3018 = vpow2.f32 %v2277_v13  ;;  %v710_v17 = vpop.f32.mrb[11].mxu0  ;;  %v716_v26 = vadd.f32 %v2587_v16, %v3406_v37 }
 0xbfe   :  { %3020 = vpow2.f32 %v2276_v14  ;;  %v711_v18 = vadd.f32 %v710_v17, %v3403_v33 }
 0xbff   :  { %v2279_v30 = vmul.f32 -1.442695, %v716_v26 }
 0xc00   :  { %v2278_v20 = vmul.f32 -1.442695, %v711_v18 }
 0xc02   :  { %3022 = vpow2.f32 %v2278_v20 }
 0xc07   :  { %v3019_v27 = vpop.eup %3018 }
 0xc08   :  { %v3021_v28 = vpop.eup %3020  ;;  %v732_v29 = vadd.f32 1.0, %v3019_v27 }
 0xc09   :  { %v731_v31 = vadd.f32 1.0, %v3021_v28 }
 0xc0a   :  { %3024 = vrcp.f32 %v732_v29 }
 0xc0b   :  { %3026 = vrcp.f32 %v731_v31 }
 0xc0c   :  { %v3023_v32 = vpop.eup %3022  ;;  %3028 = vpow2.f32 %v2279_v30 }
 0xc0d   :  { %v733_v34 = vadd.f32 1.0, %v3023_v32 }
 0xc0f   :  { %3030 = vrcp.f32 %v733_v34  ;;  %v899_v34 = vld [vmem:[#allocation2 + $0x30] sm:$0xff] }
 0xc14   :  { %v3025_v35 = vpop.eup %3024 }
 0xc15   :  { %v3027_v36 = vpop.eup %3026 }
 0xc16   :  { %v3029_v38 = vpop.eup %3028  ;;  %v744_v39 = vmul.f32 %v3027_v36, %v3025_v35 }
 0xc17   :  { %v734_v41 = vadd.f32 1.0, %v3029_v38 }
 0xc19   :  { %v3031_v40 = vpop.eup %3030  ;;  %3032 = vrcp.f32 %v734_v41 }
 0xc1a   :  { %v743_v42 = vmul.f32 %v3031_v40, %v612_v59 }
 0xc1c   :  { %v745_v43 = vadd.f32 %v744_v39, %v743_v42 }
 0xc1e   :  { %3034 = vtanh.f32 %v745_v43 }
 0xc23   :  { %v3033_v44 = vpop.eup %3032 }
 0xc28   :  { %v3035_v45 = vpop.eup %3034 }
 0xc29   :  { %v747_v46 = vmul.f32 %v3035_v45, %v3033_v44 }
 0xc2b   :  { %750 = vrot.lane.b32.xlu1 %v747_v46, %s3290_s26  ;;  %749 = vst.msk [vmem:[#allocation5 + $0x20] sm:$0xff] %vm90_vm1, %v747_v46 }
 0xc9d   :  { %v751_v47 = vpop.permute.xlu1 %750 }
 0xc9e   :  { %v752_v48 = vsel %vm73_vm0, %v751_v47, %v747_v46 }
 0xc9f   :  { %753 = vrot.lane.b32.xlu0 %v752_v48, %s3290_s26 }
 0xd11   :  { %v754_v49 = vpop.permute.xlu0 %753 }
 0xd12   :  { %v755_v50 = vsel %vm73_vm0, %v754_v49, %v747_v46 }
 0xd13   :  { %761 = vrot.lane.b32.xlu0 %v755_v50, %s3293_s4  ;;  %757 = vrot.lane.b32.xlu1 %v755_v50, %s3291_s0 }
 0xd85   :  { %v762_v52 = vpop.permute.xlu0 %761  ;;  %v758_v53 = vpop.permute.xlu1 %757 }
 0xd86   :  { %v2802_v54 = vpack.c.bf16 %v747_v46, %v758_v53  ;;  %v2808_v55 = vpack.c.bf16 %v766_v51, %v762_v52 }
 0xd88   :  { %2804 = vmatprep.subr.msk.bf16.mxu1 %vm3358_vm4, %v2802_v54 }
 0xd89   :  { %2807 = vmatpush3.bf16.msk.msra.mxu1 %vm3358_vm4, %v2802_v54 }
 0xd8a   :  { %2810 = vmatprep.subr.msk.bf16.mxu1 %vm3366_vm6, %v2808_v55 }
 0xd8d   :  { %2813 = vmatpush3.bf16.msk.msra.mxu1 %vm3366_vm6, %v2808_v55 }
 0xd90   :  { %2597 = vmatmul.mubr.msk.f32.vlgmr.msra.gmra.mrb[8].mxu1 %vm90_vm1, %v3377_v21 }
 0xd91   :  { %2599 = vmatprep.mubr.msk.f32.mxu1 %vm90_vm1, %v3382_v22 }
 0xd94   :  { %2600 = vmatmul.mubr.msk.f32.gmra.mrb[10].mxu1 %vm90_vm1, %v3391_v23 }
 0xd95   :  { %2624 = vmatprep.mubr.msk.f32.mxu1 %vm90_vm1, %v3337_v3 }
 0xe63   :  { %v2598_v56 = vpop.f32.mrb[8].mxu1 }
 0xe64   :  { %v839_v57 = vadd.f32 %v2598_v56, %v3397_v24  ;;  %v833_v58 = vpop.f32.mrb[9].mxu1 }
 0xe65   :  { %v834_v59 = vadd.f32 %v833_v58, %v3399_v25 }
 0xe66   :  { %v2287_v60 = vmul.f32 -1.442695, %v839_v57 }
 0xe67   :  { %v2286_v61 = vmul.f32 -1.442695, %v834_v59  ;;  %v2601_v62 = vpop.f32.mrb[10].mxu1 }
 0xe68   :  { %3036 = vpow2.f32 %v2287_v60  ;;  %v843_v63 = vpop.f32.mrb[11].mxu1  ;;  %v849_v2 = vadd.f32 %v2601_v62, %v3406_v37 }
 0xe69   :  { %3038 = vpow2.f32 %v2286_v61  ;;  %v844_v0 = vadd.f32 %v843_v63, %v3403_v33 }
 0xe6a   :  { %v2289_v7 = vmul.f32 -1.442695, %v849_v2 }
 0xe6b   :  { %v2288_v1 = vmul.f32 -1.442695, %v844_v0 }
 0xe6d   :  { %3040 = vpow2.f32 %v2288_v1 }
 0xe72   :  { %v3037_v4 = vpop.eup %3036 }
 0xe73   :  { %v3039_v5 = vpop.eup %3038  ;;  %v865_v6 = vadd.f32 1.0, %v3037_v4 }
 0xe74   :  { %v864_v8 = vadd.f32 1.0, %v3039_v5 }
 0xe75   :  { %3042 = vrcp.f32 %v865_v6 }
 0xe76   :  { %3044 = vrcp.f32 %v864_v8 }
 0xe77   :  { %v3041_v9 = vpop.eup %3040  ;;  %3046 = vpow2.f32 %v2289_v7 }
 0xe78   :  { %v866_v10 = vadd.f32 1.0, %v3041_v9 }
 0xe7a   :  { %3048 = vrcp.f32 %v866_v10  ;;  %v1032_v10 = vld [vmem:[#allocation2 + $0x38] sm:$0xff] }
 0xe7f   :  { %v3043_v11 = vpop.eup %3042 }
 0xe80   :  { %v3045_v12 = vpop.eup %3044 }
 0xe81   :  { %v3047_v13 = vpop.eup %3046  ;;  %v877_v14 = vmul.f32 %v3045_v12, %v3043_v11 }
 0xe82   :  { %v867_v17 = vadd.f32 1.0, %v3047_v13 }
 0xe84   :  { %v3049_v16 = vpop.eup %3048  ;;  %3050 = vrcp.f32 %v867_v17 }
 0xe85   :  { %v876_v18 = vmul.f32 %v3049_v16, %v745_v43 }
 0xe87   :  { %v878_v20 = vadd.f32 %v877_v14, %v876_v18 }
 0xe89   :  { %3052 = vtanh.f32 %v878_v20 }
 0xe8e   :  { %v3051_v26 = vpop.eup %3050 }
 0xe93   :  { %v3053_v27 = vpop.eup %3052 }
 0xe94   :  { %v880_v28 = vmul.f32 %v3053_v27, %v3051_v26 }
 0xe96   :  { %883 = vrot.lane.b32.xlu1 %v880_v28, %s3290_s26  ;;  %882 = vst.msk [vmem:[#allocation5 + $0x28] sm:$0xff] %vm90_vm1, %v880_v28 }
 0xf08   :  { %v884_v29 = vpop.permute.xlu1 %883 }
 0xf09   :  { %v885_v30 = vsel %vm73_vm0, %v884_v29, %v880_v28 }
 0xf0a   :  { %886 = vrot.lane.b32.xlu0 %v885_v30, %s3290_s26 }
 0xf7c   :  { %v887_v31 = vpop.permute.xlu0 %886 }
 0xf7d   :  { %v888_v32 = vsel %vm73_vm0, %v887_v31, %v880_v28 }
 0xf7e   :  { %894 = vrot.lane.b32.xlu0 %v888_v32, %s3293_s4  ;;  %890 = vrot.lane.b32.xlu1 %v888_v32, %s3291_s0 }
 0xff0   :  { %v895_v35 = vpop.permute.xlu0 %894  ;;  %v891_v36 = vpop.permute.xlu1 %890 }
 0xff1   :  { %v2814_v38 = vpack.c.bf16 %v880_v28, %v891_v36  ;;  %v2820_v39 = vpack.c.bf16 %v899_v34, %v895_v35 }
 0xff3   :  { %2816 = vmatprep.subr.msk.bf16.mxu0 %vm3358_vm4, %v2814_v38 }
 0xff4   :  { %2819 = vmatpush3.bf16.msk.msra.mxu0 %vm3358_vm4, %v2814_v38 }
 0xff5   :  { %2822 = vmatprep.subr.msk.bf16.mxu0 %vm3366_vm6, %v2820_v39 }
 0xff8   :  { %2825 = vmatpush3.bf16.msk.msra.mxu0 %vm3366_vm6, %v2820_v39 }
 0xffb   :  { %2611 = vmatmul.mubr.msk.f32.vlgmr.msra.gmra.mrb[12].mxu0 %vm90_vm1, %v3377_v21 }
 0xffc   :  { %2613 = vmatprep.mubr.msk.f32.mxu0 %vm90_vm1, %v3382_v22 }
 0xfff   :  { %2614 = vmatmul.mubr.msk.f32.gmra.mrb[14].mxu0 %vm90_vm1, %v3391_v23 }
0x1000   :  { %2638 = vmatprep.mubr.msk.f32.mxu0 %vm90_vm1, %v3337_v3 }
0x10ce   :  { %v2612_v40 = vpop.f32.mrb[12].mxu0 }
0x10cf   :  { %v972_v41 = vadd.f32 %v2612_v40, %v3397_v24  ;;  %v966_v42 = vpop.f32.mrb[13].mxu0 }
0x10d0   :  { %v967_v43 = vadd.f32 %v966_v42, %v3399_v25 }
0x10d1   :  { %v2297_v44 = vmul.f32 -1.442695, %v972_v41 }
0x10d2   :  { %v2296_v45 = vmul.f32 -1.442695, %v967_v43  ;;  %v2615_v46 = vpop.f32.mrb[14].mxu0 }
0x10d3   :  { %3054 = vpow2.f32 %v2297_v44  ;;  %v976_v47 = vpop.f32.mrb[15].mxu0  ;;  %v982_v50 = vadd.f32 %v2615_v46, %v3406_v37 }
0x10d4   :  { %3056 = vpow2.f32 %v2296_v45  ;;  %v977_v48 = vadd.f32 %v976_v47, %v3403_v33 }
0x10d5   :  { %v2299_v54 = vmul.f32 -1.442695, %v982_v50 }
0x10d6   :  { %v2298_v49 = vmul.f32 -1.442695, %v977_v48 }
0x10d8   :  { %3058 = vpow2.f32 %v2298_v49 }
0x10dd   :  { %v3055_v51 = vpop.eup %3054 }
0x10de   :  { %v3057_v52 = vpop.eup %3056  ;;  %v998_v53 = vadd.f32 1.0, %v3055_v51 }
0x10df   :  { %v997_v55 = vadd.f32 1.0, %v3057_v52 }
0x10e0   :  { %3060 = vrcp.f32 %v998_v53 }
0x10e1   :  { %3062 = vrcp.f32 %v997_v55 }
0x10e2   :  { %v3059_v56 = vpop.eup %3058  ;;  %3064 = vpow2.f32 %v2299_v54 }
0x10e3   :  { %v999_v57 = vadd.f32 1.0, %v3059_v56  ;;  %v1165_v56 = vld [vmem:[#allocation2 + $0x40] sm:$0xff] }
0x10e5   :  { %3066 = vrcp.f32 %v999_v57 }
0x10ea   :  { %v3061_v58 = vpop.eup %3060 }
0x10eb   :  { %v3063_v59 = vpop.eup %3062 }
0x10ec   :  { %v3065_v60 = vpop.eup %3064  ;;  %v1010_v61 = vmul.f32 %v3063_v59, %v3061_v58 }
0x10ed   :  { %v1000_v63 = vadd.f32 1.0, %v3065_v60 }
0x10ef   :  { %v3067_v62 = vpop.eup %3066  ;;  %3068 = vrcp.f32 %v1000_v63 }
0x10f0   :  { %v1009_v0 = vmul.f32 %v3067_v62, %v878_v20 }
0x10f2   :  { %v1011_v1 = vadd.f32 %v1010_v61, %v1009_v0  ;;  %v3622_v61 = vld [vmem:[%s3847_s1] sm:$0xff] }
0x10f4   :  { %3070 = vtanh.f32 %v1011_v1 }
0x10f9   :  { %v3069_v2 = vpop.eup %3068 }
0x10fe   :  { %v3071_v4 = vpop.eup %3070 }
0x10ff   :  { %v1013_v5 = vmul.f32 %v3071_v4, %v3069_v2 }
0x1101   :  { %1016 = vrot.lane.b32.xlu1 %v1013_v5, %s3290_s26  ;;  %1015 = vst.msk [vmem:[#allocation5 + $0x30] sm:$0xff] %vm90_vm1, %v1013_v5 }
0x1173   :  { %v1017_v6 = vpop.permute.xlu1 %1016 }
0x1174   :  { %v1018_v7 = vsel %vm73_vm0, %v1017_v6, %v1013_v5 }
0x1175   :  { %1019 = vrot.lane.b32.xlu0 %v1018_v7, %s3290_s26 }
0x11e7   :  { %v1020_v8 = vpop.permute.xlu0 %1019 }
0x11e8   :  { %v1021_v9 = vsel %vm73_vm0, %v1020_v8, %v1013_v5 }
0x11e9   :  { %1027 = vrot.lane.b32.xlu0 %v1021_v9, %s3293_s4  ;;  %1023 = vrot.lane.b32.xlu1 %v1021_v9, %s3291_s0 }
0x125b   :  { %v1028_v11 = vpop.permute.xlu0 %1027  ;;  %v1024_v12 = vpop.permute.xlu1 %1023 }
0x125c   :  { %v2826_v13 = vpack.c.bf16 %v1013_v5, %v1024_v12  ;;  %v2832_v14 = vpack.c.bf16 %v1032_v10, %v1028_v11 }
0x125e   :  { %2828 = vmatprep.subr.msk.bf16.mxu1 %vm3358_vm4, %v2826_v13 }
0x125f   :  { %2831 = vmatpush3.bf16.msk.msra.mxu1 %vm3358_vm4, %v2826_v13 }
0x1260   :  { %2834 = vmatprep.subr.msk.bf16.mxu1 %vm3366_vm6, %v2832_v14 }
0x1263   :  { %2837 = vmatpush3.bf16.msk.msra.mxu1 %vm3366_vm6, %v2832_v14 }
0x1266   :  { %2625 = vmatmul.mubr.msk.f32.vlgmr.msra.gmra.mrb[12].mxu1 %vm90_vm1, %v3377_v21 }
0x1267   :  { %2627 = vmatprep.mubr.msk.f32.mxu1 %vm90_vm1, %v3382_v22 }
0x126a   :  { %2628 = vmatmul.mubr.msk.f32.gmra.mrb[14].mxu1 %vm90_vm1, %v3391_v23 }
0x126b   :  { %2652 = vmatprep.mubr.msk.f32.mxu1 %vm90_vm1, %v3337_v3 }
0x1339   :  { %v2626_v16 = vpop.f32.mrb[12].mxu1 }
0x133a   :  { %v1105_v17 = vadd.f32 %v2626_v16, %v3397_v24  ;;  %v1099_v18 = vpop.f32.mrb[13].mxu1 }
0x133b   :  { %v1100_v20 = vadd.f32 %v1099_v18, %v3399_v25 }
0x133c   :  { %v2307_v26 = vmul.f32 -1.442695, %v1105_v17 }
0x133d   :  { %v2306_v27 = vmul.f32 -1.442695, %v1100_v20  ;;  %v2629_v28 = vpop.f32.mrb[14].mxu1 }
0x133e   :  { %3072 = vpow2.f32 %v2307_v26  ;;  %v1109_v29 = vpop.f32.mrb[15].mxu1  ;;  %v1115_v32 = vadd.f32 %v2629_v28, %v3406_v37 }
0x133f   :  { %3074 = vpow2.f32 %v2306_v27  ;;  %v1110_v30 = vadd.f32 %v1109_v29, %v3403_v33 }
0x1340   :  { %v2309_v36 = vmul.f32 -1.442695, %v1115_v32 }
0x1341   :  { %v2308_v31 = vmul.f32 -1.442695, %v1110_v30 }
0x1343   :  { %3076 = vpow2.f32 %v2308_v31 }
0x1348   :  { %v3073_v34 = vpop.eup %3072 }
0x1349   :  { %v3075_v3 = vpop.eup %3074  ;;  %v1131_v35 = vadd.f32 1.0, %v3073_v34 }
0x134a   :  { %v1130_v38 = vadd.f32 1.0, %v3075_v3 }
0x134b   :  { %3078 = vrcp.f32 %v1131_v35 }
0x134c   :  { %3080 = vrcp.f32 %v1130_v38 }
0x134d   :  { %v3077_v39 = vpop.eup %3076  ;;  %3082 = vpow2.f32 %v2309_v36  ;;  %v1298_v36 = vld [vmem:[#allocation2 + $0x48] sm:$0xff] }
0x134e   :  { %v1132_v40 = vadd.f32 1.0, %v3077_v39 }
0x1350   :  { %3084 = vrcp.f32 %v1132_v40 }
0x1355   :  { %v3079_v41 = vpop.eup %3078 }
0x1356   :  { %v3081_v42 = vpop.eup %3080 }
0x1357   :  { %v3083_v43 = vpop.eup %3082  ;;  %v1143_v44 = vmul.f32 %v3081_v42, %v3079_v41  ;;  %v3648_v42 = vld [vmem:[%s3847_s1 + $0x8] sm:$0xff] }
0x1358   :  { %v1133_v46 = vadd.f32 1.0, %v3083_v43  ;;  %v3655_v43 = vld [vmem:[%s3847_s1 + $0x10] sm:$0xff] }
0x135a   :  { %v3085_v45 = vpop.eup %3084  ;;  %3086 = vrcp.f32 %v1133_v46 }
0x135b   :  { %v1142_v47 = vmul.f32 %v3085_v45, %v1011_v1 }
0x135d   :  { %v1144_v48 = vadd.f32 %v1143_v44, %v1142_v47  ;;  %v3662_v44 = vld [vmem:[%s3847_s1 + $0x18] sm:$0xff]  ;;  %s3295_s1 = smov [#allocation5]  }
0x135f   :  { %3088 = vtanh.f32 %v1144_v48 }
0x1364   :  { %v3087_v49 = vpop.eup %3086 }
0x1369   :  { %v3089_v50 = vpop.eup %3088 }
0x136a   :  { %v1146_v51 = vmul.f32 %v3089_v50, %v3087_v49 }
0x136c   :  { %1149 = vrot.lane.b32.xlu1 %v1146_v51, %s3290_s26  ;;  %1148 = vst.msk [vmem:[#allocation5 + $0x38] sm:$0xff] %vm90_vm1, %v1146_v51 }
0x13de   :  { %v1150_v52 = vpop.permute.xlu1 %1149 }
0x13df   :  { %v1151_v53 = vsel %vm73_vm0, %v1150_v52, %v1146_v51 }
0x13e0   :  { %1152 = vrot.lane.b32.xlu0 %v1151_v53, %s3290_s26 }
0x1452   :  { %v1153_v54 = vpop.permute.xlu0 %1152 }
0x1453   :  { %v1154_v55 = vsel %vm73_vm0, %v1153_v54, %v1146_v51 }
0x1454   :  { %1160 = vrot.lane.b32.xlu0 %v1154_v55, %s3293_s4  ;;  %1156 = vrot.lane.b32.xlu1 %v1154_v55, %s3291_s0 }
0x14c6   :  { %v1161_v57 = vpop.permute.xlu0 %1160  ;;  %v1157_v58 = vpop.permute.xlu1 %1156 }
0x14c7   :  { %v2838_v59 = vpack.c.bf16 %v1146_v51, %v1157_v58  ;;  %v2844_v60 = vpack.c.bf16 %v1165_v56, %v1161_v57 }
0x14c9   :  { %2840 = vmatprep.subr.msk.bf16.mxu0 %vm3358_vm4, %v2838_v59 }
0x14ca   :  { %2843 = vmatpush3.bf16.msk.msra.mxu0 %vm3358_vm4, %v2838_v59 }
0x14cb   :  { %2846 = vmatprep.subr.msk.bf16.mxu0 %vm3366_vm6, %v2844_v60 }
0x14ce   :  { %2849 = vmatpush3.bf16.msk.msra.mxu0 %vm3366_vm6, %v2844_v60 }
0x14d1   :  { %2639 = vmatmul.mubr.msk.f32.vlgmr.msra.gmra.mrb[16].mxu0 %vm90_vm1, %v3377_v21 }
0x14d2   :  { %2641 = vmatprep.mubr.msk.f32.mxu0 %vm90_vm1, %v3382_v22 }
0x14d5   :  { %2642 = vmatmul.mubr.msk.f32.gmra.mrb[18].mxu0 %vm90_vm1, %v3391_v23 }
0x14d6   :  { %2666 = vmatprep.mubr.msk.f32.mxu0 %vm90_vm1, %v3622_v61 }
0x15a4   :  { %v2640_v62 = vpop.f32.mrb[16].mxu0 }
0x15a5   :  { %v1238_v63 = vadd.f32 %v2640_v62, %v3397_v24  ;;  %v1232_v0 = vpop.f32.mrb[17].mxu0 }
0x15a6   :  { %v1233_v21 = vadd.f32 %v1232_v0, %v3399_v25 }
0x15a7   :  { %v2317_v1 = vmul.f32 -1.442695, %v1238_v63 }
0x15a8   :  { %v2316_v2 = vmul.f32 -1.442695, %v1233_v21  ;;  %v2643_v22 = vpop.f32.mrb[18].mxu0 }
0x15a9   :  { %3090 = vpow2.f32 %v2317_v1  ;;  %v1242_v4 = vpop.f32.mrb[19].mxu0  ;;  %v1248_v6 = vadd.f32 %v2643_v22, %v3406_v37 }
0x15aa   :  { %3092 = vpow2.f32 %v2316_v2  ;;  %v1243_v23 = vadd.f32 %v1242_v4, %v3403_v33 }
0x15ab   :  { %v2319_v10 = vmul.f32 -1.442695, %v1248_v6 }
0x15ac   :  { %v2318_v5 = vmul.f32 -1.442695, %v1243_v23 }
0x15ae   :  { %3094 = vpow2.f32 %v2318_v5 }
0x15b3   :  { %v3091_v7 = vpop.eup %3090 }
0x15b4   :  { %v3093_v8 = vpop.eup %3092  ;;  %v1264_v9 = vadd.f32 1.0, %v3091_v7 }
0x15b5   :  { %v1263_v11 = vadd.f32 1.0, %v3093_v8 }
0x15b6   :  { %3096 = vrcp.f32 %v1264_v9 }
0x15b7   :  { %3098 = vrcp.f32 %v1263_v11 }
0x15b8   :  { %v3095_v12 = vpop.eup %3094  ;;  %3100 = vpow2.f32 %v2319_v10 }
0x15b9   :  { %v1265_v13 = vadd.f32 1.0, %v3095_v12 }
0x15bb   :  { %3102 = vrcp.f32 %v1265_v13  ;;  %v1431_v13 = vld [vmem:[#allocation2 + $0x50] sm:$0xff] }
0x15c0   :  { %v3097_v14 = vpop.eup %3096 }
0x15c1   :  { %v3099_v16 = vpop.eup %3098 }
0x15c2   :  { %v3101_v17 = vpop.eup %3100  ;;  %v1276_v18 = vmul.f32 %v3099_v16, %v3097_v14 }
0x15c3   :  { %v1266_v26 = vadd.f32 1.0, %v3101_v17 }
0x15c5   :  { %v3103_v20 = vpop.eup %3102  ;;  %3104 = vrcp.f32 %v1266_v26 }
0x15c6   :  { %v1275_v27 = vmul.f32 %v3103_v20, %v1144_v48 }
0x15c8   :  { %v1277_v28 = vadd.f32 %v1276_v18, %v1275_v27 }
0x15ca   :  { %3106 = vtanh.f32 %v1277_v28 }
0x15cf   :  { %v3105_v29 = vpop.eup %3104 }
0x15d4   :  { %v3107_v30 = vpop.eup %3106 }
0x15d5   :  { %v1279_v31 = vmul.f32 %v3107_v30, %v3105_v29 }
0x15d7   :  { %1282 = vrot.lane.b32.xlu1 %v1279_v31, %s3290_s26  ;;  %1281 = vst.msk [vmem:[#allocation5 + $0x40] sm:$0xff] %vm90_vm1, %v1279_v31 }
0x1649   :  { %v1283_v32 = vpop.permute.xlu1 %1282 }
0x164a   :  { %v1284_v34 = vsel %vm73_vm0, %v1283_v32, %v1279_v31 }
0x164b   :  { %1285 = vrot.lane.b32.xlu0 %v1284_v34, %s3290_s26 }
0x16bd   :  { %v1286_v3 = vpop.permute.xlu0 %1285 }
0x16be   :  { %v1287_v35 = vsel %vm73_vm0, %v1286_v3, %v1279_v31 }
0x16bf   :  { %1293 = vrot.lane.b32.xlu0 %v1287_v35, %s3293_s4  ;;  %1289 = vrot.lane.b32.xlu1 %v1287_v35, %s3291_s0 }
0x1731   :  { %v1294_v38 = vpop.permute.xlu0 %1293  ;;  %v1290_v39 = vpop.permute.xlu1 %1289 }
0x1732   :  { %v2850_v40 = vpack.c.bf16 %v1279_v31, %v1290_v39  ;;  %v2856_v41 = vpack.c.bf16 %v1298_v36, %v1294_v38 }
0x1734   :  { %2852 = vmatprep.subr.msk.bf16.mxu1 %vm3358_vm4, %v2850_v40 }
0x1735   :  { %2855 = vmatpush3.bf16.msk.msra.mxu1 %vm3358_vm4, %v2850_v40 }
0x1736   :  { %2858 = vmatprep.subr.msk.bf16.mxu1 %vm3366_vm6, %v2856_v41 }
0x1739   :  { %2861 = vmatpush3.bf16.msk.msra.mxu1 %vm3366_vm6, %v2856_v41 }
0x173c   :  { %2653 = vmatmul.mubr.msk.f32.vlgmr.msra.gmra.mrb[16].mxu1 %vm90_vm1, %v3648_v42 }
0x173d   :  { %2655 = vmatprep.mubr.msk.f32.mxu1 %vm90_vm1, %v3655_v43 }
0x1740   :  { %2656 = vmatmul.mubr.msk.f32.gmra.mrb[18].mxu1 %vm90_vm1, %v3662_v44 }
0x1741   :  { %2680 = vmatprep.mubr.msk.f32.mxu1 %vm90_vm1, %v3622_v61 }
0x180f   :  { %v2654_v45 = vpop.f32.mrb[16].mxu1 }
0x1810   :  { %v1371_v46 = vadd.f32 %v2654_v45, %v3397_v24  ;;  %v1365_v47 = vpop.f32.mrb[17].mxu1 }
0x1811   :  { %v1366_v48 = vadd.f32 %v1365_v47, %v3399_v25 }
0x1812   :  { %v2327_v49 = vmul.f32 -1.442695, %v1371_v46 }
0x1813   :  { %v2326_v50 = vmul.f32 -1.442695, %v1366_v48  ;;  %v2657_v51 = vpop.f32.mrb[18].mxu1 }
0x1814   :  { %3108 = vpow2.f32 %v2327_v49  ;;  %v1375_v52 = vpop.f32.mrb[19].mxu1  ;;  %v1381_v55 = vadd.f32 %v2657_v51, %v3406_v37 }
0x1815   :  { %3110 = vpow2.f32 %v2326_v50  ;;  %v1376_v53 = vadd.f32 %v1375_v52, %v3403_v33 }
0x1816   :  { %v2329_v59 = vmul.f32 -1.442695, %v1381_v55 }
0x1817   :  { %v2328_v54 = vmul.f32 -1.442695, %v1376_v53 }
0x1819   :  { %3112 = vpow2.f32 %v2328_v54 }
0x181e   :  { %v3109_v56 = vpop.eup %3108 }
0x181f   :  { %v3111_v57 = vpop.eup %3110  ;;  %v1397_v58 = vadd.f32 1.0, %v3109_v56 }
0x1820   :  { %v1396_v60 = vadd.f32 1.0, %v3111_v57 }
0x1821   :  { %3114 = vrcp.f32 %v1397_v58 }
0x1822   :  { %3116 = vrcp.f32 %v1396_v60 }
0x1823   :  { %v3113_v62 = vpop.eup %3112  ;;  %3118 = vpow2.f32 %v2329_v59 }
0x1824   :  { %v1398_v63 = vadd.f32 1.0, %v3113_v62 }
0x1826   :  { %3120 = vrcp.f32 %v1398_v63  ;;  %v1564_v63 = vld [vmem:[#allocation2 + $0x58] sm:$0xff] }
0x182b   :  { %v3115_v0 = vpop.eup %3114 }
0x182c   :  { %v3117_v21 = vpop.eup %3116 }
0x182d   :  { %v3119_v1 = vpop.eup %3118  ;;  %v1409_v2 = vmul.f32 %v3117_v21, %v3115_v0 }
0x182e   :  { %v1399_v4 = vadd.f32 1.0, %v3119_v1 }
0x1830   :  { %v3121_v22 = vpop.eup %3120  ;;  %3122 = vrcp.f32 %v1399_v4 }
0x1831   :  { %v1408_v23 = vmul.f32 %v3121_v22, %v1277_v28 }
0x1833   :  { %v1410_v5 = vadd.f32 %v1409_v2, %v1408_v23 }
0x1835   :  { %3124 = vtanh.f32 %v1410_v5 }
0x183a   :  { %v3123_v6 = vpop.eup %3122 }
0x183f   :  { %v3125_v7 = vpop.eup %3124 }
0x1840   :  { %v1412_v8 = vmul.f32 %v3125_v7, %v3123_v6 }
0x1842   :  { %1415 = vrot.lane.b32.xlu1 %v1412_v8, %s3290_s26  ;;  %1414 = vst.msk [vmem:[#allocation5 + $0x48] sm:$0xff] %vm90_vm1, %v1412_v8 }
0x18b4   :  { %v1416_v9 = vpop.permute.xlu1 %1415 }
0x18b5   :  { %v1417_v10 = vsel %vm73_vm0, %v1416_v9, %v1412_v8 }
0x18b6   :  { %1418 = vrot.lane.b32.xlu0 %v1417_v10, %s3290_s26 }
0x1928   :  { %v1419_v11 = vpop.permute.xlu0 %1418 }
0x1929   :  { %v1420_v12 = vsel %vm73_vm0, %v1419_v11, %v1412_v8 }
0x192a   :  { %1426 = vrot.lane.b32.xlu0 %v1420_v12, %s3293_s4  ;;  %1422 = vrot.lane.b32.xlu1 %v1420_v12, %s3291_s0 }
0x199c   :  { %v1427_v14 = vpop.permute.xlu0 %1426  ;;  %v1423_v16 = vpop.permute.xlu1 %1422 }
0x199d   :  { %v2862_v17 = vpack.c.bf16 %v1412_v8, %v1423_v16  ;;  %v2868_v18 = vpack.c.bf16 %v1431_v13, %v1427_v14 }
0x199f   :  { %2864 = vmatprep.subr.msk.bf16.mxu0 %vm3358_vm4, %v2862_v17 }
0x19a0   :  { %2867 = vmatpush3.bf16.msk.msra.mxu0 %vm3358_vm4, %v2862_v17 }
0x19a1   :  { %2870 = vmatprep.subr.msk.bf16.mxu0 %vm3366_vm6, %v2868_v18 }
0x19a4   :  { %2873 = vmatpush3.bf16.msk.msra.mxu0 %vm3366_vm6, %v2868_v18 }
0x19a7   :  { %2667 = vmatmul.mubr.msk.f32.vlgmr.msra.gmra.mrb[20].mxu0 %vm90_vm1, %v3648_v42 }
0x19a8   :  { %2669 = vmatprep.mubr.msk.f32.mxu0 %vm90_vm1, %v3655_v43 }
0x19ab   :  { %2670 = vmatmul.mubr.msk.f32.gmra.mrb[22].mxu0 %vm90_vm1, %v3662_v44 }
0x19ac   :  { %2694 = vmatprep.mubr.msk.f32.mxu0 %vm90_vm1, %v3622_v61 }
0x1a7a   :  { %v2668_v20 = vpop.f32.mrb[20].mxu0 }
0x1a7b   :  { %v1504_v26 = vadd.f32 %v2668_v20, %v3397_v24  ;;  %v1498_v27 = vpop.f32.mrb[21].mxu0 }
0x1a7c   :  { %v1499_v28 = vadd.f32 %v1498_v27, %v3399_v25 }
0x1a7d   :  { %v2337_v29 = vmul.f32 -1.442695, %v1504_v26 }
0x1a7e   :  { %v2336_v30 = vmul.f32 -1.442695, %v1499_v28  ;;  %v2671_v31 = vpop.f32.mrb[22].mxu0 }
0x1a7f   :  { %3126 = vpow2.f32 %v2337_v29  ;;  %v1508_v32 = vpop.f32.mrb[23].mxu0  ;;  %v1514_v35 = vadd.f32 %v2671_v31, %v3406_v37 }
0x1a80   :  { %3128 = vpow2.f32 %v2336_v30  ;;  %v1509_v34 = vadd.f32 %v1508_v32, %v3403_v33 }
0x1a81   :  { %v2339_v40 = vmul.f32 -1.442695, %v1514_v35 }
0x1a82   :  { %v2338_v3 = vmul.f32 -1.442695, %v1509_v34 }
0x1a84   :  { %3130 = vpow2.f32 %v2338_v3 }
0x1a89   :  { %v3127_v36 = vpop.eup %3126 }
0x1a8a   :  { %v3129_v38 = vpop.eup %3128  ;;  %v1530_v39 = vadd.f32 1.0, %v3127_v36 }
0x1a8b   :  { %v1529_v41 = vadd.f32 1.0, %v3129_v38 }
0x1a8c   :  { %3132 = vrcp.f32 %v1530_v39 }
0x1a8d   :  { %3134 = vrcp.f32 %v1529_v41 }
0x1a8e   :  { %v3131_v45 = vpop.eup %3130  ;;  %3136 = vpow2.f32 %v2339_v40 }
0x1a8f   :  { %v1531_v46 = vadd.f32 1.0, %v3131_v45 }
0x1a91   :  { %3138 = vrcp.f32 %v1531_v46  ;;  %v1697_v46 = vld [vmem:[#allocation2 + $0x60] sm:$0xff] }
0x1a96   :  { %v3133_v47 = vpop.eup %3132 }
0x1a97   :  { %v3135_v48 = vpop.eup %3134 }
0x1a98   :  { %v3137_v49 = vpop.eup %3136  ;;  %v1542_v50 = vmul.f32 %v3135_v48, %v3133_v47 }
0x1a99   :  { %v1532_v52 = vadd.f32 1.0, %v3137_v49 }
0x1a9b   :  { %v3139_v51 = vpop.eup %3138  ;;  %3140 = vrcp.f32 %v1532_v52 }
0x1a9c   :  { %v1541_v53 = vmul.f32 %v3139_v51, %v1410_v5 }
0x1a9e   :  { %v1543_v54 = vadd.f32 %v1542_v50, %v1541_v53 }
0x1aa0   :  { %3142 = vtanh.f32 %v1543_v54 }
0x1aa5   :  { %v3141_v55 = vpop.eup %3140 }
0x1aaa   :  { %v3143_v56 = vpop.eup %3142 }
0x1aab   :  { %v1545_v57 = vmul.f32 %v3143_v56, %v3141_v55 }
0x1aad   :  { %1548 = vrot.lane.b32.xlu1 %v1545_v57, %s3290_s26  ;;  %1547 = vst.msk [vmem:[#allocation5 + $0x50] sm:$0xff] %vm90_vm1, %v1545_v57 }
0x1b1f   :  { %v1549_v58 = vpop.permute.xlu1 %1548 }
0x1b20   :  { %v1550_v59 = vsel %vm73_vm0, %v1549_v58, %v1545_v57 }
0x1b21   :  { %1551 = vrot.lane.b32.xlu0 %v1550_v59, %s3290_s26 }
0x1b93   :  { %v1552_v60 = vpop.permute.xlu0 %1551 }
0x1b94   :  { %v1553_v62 = vsel %vm73_vm0, %v1552_v60, %v1545_v57 }
0x1b95   :  { %1559 = vrot.lane.b32.xlu0 %v1553_v62, %s3293_s4  ;;  %1555 = vrot.lane.b32.xlu1 %v1553_v62, %s3291_s0 }
0x1c07   :  { %v1560_v0 = vpop.permute.xlu0 %1559  ;;  %v1556_v21 = vpop.permute.xlu1 %1555 }
0x1c08   :  { %v2874_v1 = vpack.c.bf16 %v1545_v57, %v1556_v21  ;;  %v2880_v2 = vpack.c.bf16 %v1564_v63, %v1560_v0 }
0x1c0a   :  { %2876 = vmatprep.subr.msk.bf16.mxu1 %vm3358_vm4, %v2874_v1 }
0x1c0b   :  { %2879 = vmatpush3.bf16.msk.msra.mxu1 %vm3358_vm4, %v2874_v1 }
0x1c0c   :  { %2882 = vmatprep.subr.msk.bf16.mxu1 %vm3366_vm6, %v2880_v2 }
0x1c0f   :  { %2885 = vmatpush3.bf16.msk.msra.mxu1 %vm3366_vm6, %v2880_v2 }
0x1c12   :  { %2681 = vmatmul.mubr.msk.f32.vlgmr.msra.gmra.mrb[20].mxu1 %vm90_vm1, %v3648_v42 }
0x1c13   :  { %2683 = vmatprep.mubr.msk.f32.mxu1 %vm90_vm1, %v3655_v43 }
0x1c16   :  { %2684 = vmatmul.mubr.msk.f32.gmra.mrb[22].mxu1 %vm90_vm1, %v3662_v44 }
0x1c17   :  { %2708 = vmatprep.mubr.msk.f32.mxu1 %vm90_vm1, %v3622_v61 }
0x1ce5   :  { %v2682_v22 = vpop.f32.mrb[20].mxu1 }
0x1ce6   :  { %v1637_v4 = vadd.f32 %v2682_v22, %v3397_v24  ;;  %v1631_v23 = vpop.f32.mrb[21].mxu1 }
0x1ce7   :  { %v1632_v5 = vadd.f32 %v1631_v23, %v3399_v25 }
0x1ce8   :  { %v2347_v6 = vmul.f32 -1.442695, %v1637_v4 }
0x1ce9   :  { %v2346_v7 = vmul.f32 -1.442695, %v1632_v5  ;;  %v2685_v8 = vpop.f32.mrb[22].mxu1 }
0x1cea   :  { %3144 = vpow2.f32 %v2347_v6  ;;  %v1641_v9 = vpop.f32.mrb[23].mxu1  ;;  %v1647_v12 = vadd.f32 %v2685_v8, %v3406_v37 }
0x1ceb   :  { %3146 = vpow2.f32 %v2346_v7  ;;  %v1642_v10 = vadd.f32 %v1641_v9, %v3403_v33 }
0x1cec   :  { %v2349_v17 = vmul.f32 -1.442695, %v1647_v12 }
0x1ced   :  { %v2348_v11 = vmul.f32 -1.442695, %v1642_v10 }
0x1cef   :  { %3148 = vpow2.f32 %v2348_v11 }
0x1cf4   :  { %v3145_v13 = vpop.eup %3144 }
0x1cf5   :  { %v3147_v14 = vpop.eup %3146  ;;  %v1663_v16 = vadd.f32 1.0, %v3145_v13 }
0x1cf6   :  { %v1662_v18 = vadd.f32 1.0, %v3147_v14 }
0x1cf7   :  { %3150 = vrcp.f32 %v1663_v16 }
0x1cf8   :  { %3152 = vrcp.f32 %v1662_v18 }
0x1cf9   :  { %v3149_v20 = vpop.eup %3148  ;;  %3154 = vpow2.f32 %v2349_v17 }
0x1cfa   :  { %v1664_v26 = vadd.f32 1.0, %v3149_v20 }
0x1cfc   :  { %3156 = vrcp.f32 %v1664_v26  ;;  %v1830_v26 = vld [vmem:[#allocation2 + $0x68] sm:$0xff] }
0x1d01   :  { %v3151_v27 = vpop.eup %3150 }
0x1d02   :  { %v3153_v28 = vpop.eup %3152 }
0x1d03   :  { %v3155_v29 = vpop.eup %3154  ;;  %v1675_v30 = vmul.f32 %v3153_v28, %v3151_v27 }
0x1d04   :  { %v1665_v32 = vadd.f32 1.0, %v3155_v29 }
0x1d06   :  { %v3157_v31 = vpop.eup %3156  ;;  %3158 = vrcp.f32 %v1665_v32 }
0x1d07   :  { %v1674_v34 = vmul.f32 %v3157_v31, %v1543_v54 }
0x1d09   :  { %v1676_v3 = vadd.f32 %v1675_v30, %v1674_v34 }
0x1d0b   :  { %3160 = vtanh.f32 %v1676_v3 }
0x1d10   :  { %v3159_v35 = vpop.eup %3158 }
0x1d15   :  { %v3161_v36 = vpop.eup %3160 }
0x1d16   :  { %v1678_v38 = vmul.f32 %v3161_v36, %v3159_v35 }
0x1d18   :  { %1681 = vrot.lane.b32.xlu1 %v1678_v38, %s3290_s26  ;;  %1680 = vst.msk [vmem:[#allocation5 + $0x58] sm:$0xff] %vm90_vm1, %v1678_v38 }
0x1d8a   :  { %v1682_v39 = vpop.permute.xlu1 %1681 }
0x1d8b   :  { %v1683_v40 = vsel %vm73_vm0, %v1682_v39, %v1678_v38 }
0x1d8c   :  { %1684 = vrot.lane.b32.xlu0 %v1683_v40, %s3290_s26 }
0x1dfe   :  { %v1685_v41 = vpop.permute.xlu0 %1684 }
0x1dff   :  { %v1686_v45 = vsel %vm73_vm0, %v1685_v41, %v1678_v38 }
0x1e00   :  { %1692 = vrot.lane.b32.xlu0 %v1686_v45, %s3293_s4  ;;  %1688 = vrot.lane.b32.xlu1 %v1686_v45, %s3291_s0 }
0x1e72   :  { %v1693_v47 = vpop.permute.xlu0 %1692  ;;  %v1689_v48 = vpop.permute.xlu1 %1688 }
0x1e73   :  { %v2886_v49 = vpack.c.bf16 %v1678_v38, %v1689_v48  ;;  %v2892_v50 = vpack.c.bf16 %v1697_v46, %v1693_v47 }
0x1e75   :  { %2888 = vmatprep.subr.msk.bf16.mxu0 %vm3358_vm4, %v2886_v49 }
0x1e76   :  { %2891 = vmatpush3.bf16.msk.msra.mxu0 %vm3358_vm4, %v2886_v49 }
0x1e77   :  { %2894 = vmatprep.subr.msk.bf16.mxu0 %vm3366_vm6, %v2892_v50 }
0x1e7a   :  { %2897 = vmatpush3.bf16.msk.msra.mxu0 %vm3366_vm6, %v2892_v50 }
0x1e7d   :  { %2695 = vmatmul.mubr.msk.f32.vlgmr.msra.gmra.mrb[24].mxu0 %vm90_vm1, %v3648_v42 }
0x1e7e   :  { %2697 = vmatprep.mubr.msk.f32.mxu0 %vm90_vm1, %v3655_v43 }
0x1e81   :  { %2698 = vmatmul.mubr.msk.f32.gmra.mrb[26].mxu0 %vm90_vm1, %v3662_v44 }
0x1e82   :  { %2722 = vmatprep.mubr.msk.f32.mxu0 %vm90_vm1, %v3622_v61 }
0x1f50   :  { %v2696_v51 = vpop.f32.mrb[24].mxu0 }
0x1f51   :  { %v1770_v52 = vadd.f32 %v2696_v51, %v3397_v24  ;;  %v1764_v53 = vpop.f32.mrb[25].mxu0 }
0x1f52   :  { %v1765_v54 = vadd.f32 %v1764_v53, %v3399_v25 }
0x1f53   :  { %v2357_v55 = vmul.f32 -1.442695, %v1770_v52 }
0x1f54   :  { %v2356_v56 = vmul.f32 -1.442695, %v1765_v54  ;;  %v2699_v57 = vpop.f32.mrb[26].mxu0 }
0x1f55   :  { %3162 = vpow2.f32 %v2357_v55  ;;  %v1774_v58 = vpop.f32.mrb[27].mxu0  ;;  %v1780_v62 = vadd.f32 %v2699_v57, %v3406_v37 }
0x1f56   :  { %3164 = vpow2.f32 %v2356_v56  ;;  %v1775_v59 = vadd.f32 %v1774_v58, %v3403_v33 }
0x1f57   :  { %v2359_v1 = vmul.f32 -1.442695, %v1780_v62 }
0x1f58   :  { %v2358_v60 = vmul.f32 -1.442695, %v1775_v59 }
0x1f5a   :  { %3166 = vpow2.f32 %v2358_v60 }
0x1f5f   :  { %v3163_v63 = vpop.eup %3162 }
0x1f60   :  { %v3165_v0 = vpop.eup %3164  ;;  %v1796_v21 = vadd.f32 1.0, %v3163_v63 }
0x1f61   :  { %v1795_v2 = vadd.f32 1.0, %v3165_v0 }
0x1f62   :  { %3168 = vrcp.f32 %v1796_v21 }
0x1f63   :  { %3170 = vrcp.f32 %v1795_v2 }
0x1f64   :  { %v3167_v22 = vpop.eup %3166  ;;  %3172 = vpow2.f32 %v2359_v1 }
0x1f65   :  { %v1797_v4 = vadd.f32 1.0, %v3167_v22  ;;  %v1963_v22 = vld [vmem:[#allocation2 + $0x70] sm:$0xff] }
0x1f67   :  { %3174 = vrcp.f32 %v1797_v4 }
0x1f6c   :  { %v3169_v23 = vpop.eup %3168 }
0x1f6d   :  { %v3171_v5 = vpop.eup %3170 }
0x1f6e   :  { %v3173_v6 = vpop.eup %3172  ;;  %v1808_v7 = vmul.f32 %v3171_v5, %v3169_v23 }
0x1f6f   :  { %v1798_v9 = vadd.f32 1.0, %v3173_v6 }
0x1f71   :  { %v3175_v8 = vpop.eup %3174  ;;  %3176 = vrcp.f32 %v1798_v9 }
0x1f72   :  { %v1807_v10 = vmul.f32 %v3175_v8, %v1676_v3 }
0x1f74   :  { %v1809_v11 = vadd.f32 %v1808_v7, %v1807_v10 }
0x1f76   :  { %3178 = vtanh.f32 %v1809_v11 }
0x1f7b   :  { %v3177_v12 = vpop.eup %3176 }
0x1f80   :  { %v3179_v13 = vpop.eup %3178 }
0x1f81   :  { %v1811_v14 = vmul.f32 %v3179_v13, %v3177_v12 }
0x1f83   :  { %1814 = vrot.lane.b32.xlu1 %v1811_v14, %s3290_s26  ;;  %1813 = vst.msk [vmem:[#allocation5 + $0x60] sm:$0xff] %vm90_vm1, %v1811_v14 }
0x1ff5   :  { %v1815_v16 = vpop.permute.xlu1 %1814 }
0x1ff6   :  { %v1816_v17 = vsel %vm73_vm0, %v1815_v16, %v1811_v14 }
0x1ff7   :  { %1817 = vrot.lane.b32.xlu0 %v1816_v17, %s3290_s26 }
0x2069   :  { %v1818_v18 = vpop.permute.xlu0 %1817 }
0x206a   :  { %v1819_v20 = vsel %vm73_vm0, %v1818_v18, %v1811_v14 }
0x206b   :  { %1825 = vrot.lane.b32.xlu0 %v1819_v20, %s3293_s4  ;;  %1821 = vrot.lane.b32.xlu1 %v1819_v20, %s3291_s0 }
0x20dd   :  { %v1826_v27 = vpop.permute.xlu0 %1825  ;;  %v1822_v28 = vpop.permute.xlu1 %1821 }
0x20de   :  { %v2898_v29 = vpack.c.bf16 %v1811_v14, %v1822_v28  ;;  %v2904_v30 = vpack.c.bf16 %v1830_v26, %v1826_v27 }
0x20e0   :  { %2900 = vmatprep.subr.msk.bf16.mxu1 %vm3358_vm4, %v2898_v29 }
0x20e1   :  { %2903 = vmatpush3.bf16.msk.msra.mxu1 %vm3358_vm4, %v2898_v29 }
0x20e2   :  { %2906 = vmatprep.subr.msk.bf16.mxu1 %vm3366_vm6, %v2904_v30 }
0x20e5   :  { %2909 = vmatpush3.bf16.msk.msra.mxu1 %vm3366_vm6, %v2904_v30 }
0x20e8   :  { %2709 = vmatmul.mubr.msk.f32.vlgmr.msra.gmra.mrb[24].mxu1 %vm90_vm1, %v3648_v42 }
0x20e9   :  { %2711 = vmatprep.mubr.msk.f32.mxu1 %vm90_vm1, %v3655_v43 }
0x20ec   :  { %2712 = vmatmul.mubr.msk.f32.gmra.mrb[26].mxu1 %vm90_vm1, %v3662_v44 }
0x20ed   :  { %2736 = vmatprep.mubr.msk.f32.mxu1 %vm90_vm1, %v3622_v61 }
0x21bb   :  { %v2710_v31 = vpop.f32.mrb[24].mxu1 }
0x21bc   :  { %v1903_v32 = vadd.f32 %v2710_v31, %v3397_v24  ;;  %v1897_v34 = vpop.f32.mrb[25].mxu1 }
0x21bd   :  { %v1898_v3 = vadd.f32 %v1897_v34, %v3399_v25 }
0x21be   :  { %v2367_v35 = vmul.f32 -1.442695, %v1903_v32 }
0x21bf   :  { %v2366_v36 = vmul.f32 -1.442695, %v1898_v3  ;;  %v2713_v38 = vpop.f32.mrb[26].mxu1 }
0x21c0   :  { %3180 = vpow2.f32 %v2367_v35  ;;  %v1907_v39 = vpop.f32.mrb[27].mxu1  ;;  %v1913_v45 = vadd.f32 %v2713_v38, %v3406_v37 }
0x21c1   :  { %3182 = vpow2.f32 %v2366_v36  ;;  %v1908_v40 = vadd.f32 %v1907_v39, %v3403_v33 }
0x21c2   :  { %v2369_v48 = vmul.f32 -1.442695, %v1913_v45 }
0x21c3   :  { %v2368_v41 = vmul.f32 -1.442695, %v1908_v40 }
0x21c5   :  { %3184 = vpow2.f32 %v2368_v41 }
0x21ca   :  { %v3181_v46 = vpop.eup %3180 }
0x21cb   :  { %v3183_v61 = vpop.eup %3182  ;;  %v1929_v47 = vadd.f32 1.0, %v3181_v46 }
0x21cc   :  { %v1928_v49 = vadd.f32 1.0, %v3183_v61 }
0x21cd   :  { %3186 = vrcp.f32 %v1929_v47 }
0x21ce   :  { %3188 = vrcp.f32 %v1928_v49 }
0x21cf   :  { %v3185_v50 = vpop.eup %3184  ;;  %3190 = vpow2.f32 %v2369_v48 }
0x21d0   :  { %v1930_v51 = vadd.f32 1.0, %v3185_v50  ;;  %v2096_v50 = vld [vmem:[#allocation2 + $0x78] sm:$0xff] }
0x21d2   :  { %3192 = vrcp.f32 %v1930_v51 }
0x21d7   :  { %v3187_v52 = vpop.eup %3186 }
0x21d8   :  { %v3189_v53 = vpop.eup %3188 }
0x21d9   :  { %v3191_v54 = vpop.eup %3190  ;;  %v1941_v55 = vmul.f32 %v3189_v53, %v3187_v52 }
0x21da   :  { %v1931_v57 = vadd.f32 1.0, %v3191_v54 }
0x21dc   :  { %v3193_v56 = vpop.eup %3192  ;;  %3194 = vrcp.f32 %v1931_v57 }
0x21dd   :  { %v1940_v58 = vmul.f32 %v3193_v56, %v1809_v11 }
0x21df   :  { %v1942_v59 = vadd.f32 %v1941_v55, %v1940_v58 }
0x21e1   :  { %3196 = vtanh.f32 %v1942_v59 }
0x21e6   :  { %v3195_v60 = vpop.eup %3194 }
0x21eb   :  { %v3197_v62 = vpop.eup %3196 }
0x21ec   :  { %v1944_v63 = vmul.f32 %v3197_v62, %v3195_v60 }
0x21ee   :  { %1947 = vrot.lane.b32.xlu1 %v1944_v63, %s3290_s26  ;;  %1946 = vst.msk [vmem:[#allocation5 + $0x68] sm:$0xff] %vm90_vm1, %v1944_v63 }
0x2260   :  { %v1948_v0 = vpop.permute.xlu1 %1947 }
0x2261   :  { %v1949_v21 = vsel %vm73_vm0, %v1948_v0, %v1944_v63 }
0x2262   :  { %1950 = vrot.lane.b32.xlu0 %v1949_v21, %s3290_s26 }
0x22d4   :  { %v1951_v1 = vpop.permute.xlu0 %1950 }
0x22d5   :  { %v1952_v2 = vsel %vm73_vm0, %v1951_v1, %v1944_v63 }
0x22d6   :  { %1958 = vrot.lane.b32.xlu0 %v1952_v2, %s3293_s4  ;;  %1954 = vrot.lane.b32.xlu1 %v1952_v2, %s3291_s0 }
0x2348   :  { %v1959_v4 = vpop.permute.xlu0 %1958  ;;  %v1955_v23 = vpop.permute.xlu1 %1954 }
0x2349   :  { %v2910_v5 = vpack.c.bf16 %v1944_v63, %v1955_v23  ;;  %v2916_v6 = vpack.c.bf16 %v1963_v22, %v1959_v4 }
0x234b   :  { %2912 = vmatprep.subr.msk.bf16.mxu0 %vm3358_vm4, %v2910_v5 }
0x234c   :  { %2915 = vmatpush3.bf16.msk.msra.mxu0 %vm3358_vm4, %v2910_v5 }
0x234d   :  { %2918 = vmatprep.subr.msk.bf16.mxu0 %vm3366_vm6, %v2916_v6 }
0x2350   :  { %2921 = vmatpush3.bf16.msk.msra.mxu0 %vm3366_vm6, %v2916_v6 }
0x2353   :  { %2723 = vmatmul.mubr.msk.f32.vlgmr.msra.gmra.mrb[28].mxu0 %vm90_vm1, %v3648_v42 }
0x2354   :  { %2725 = vmatprep.mubr.msk.f32.mxu0 %vm90_vm1, %v3655_v43 }
0x2357   :  { %2726 = vmatmul.mubr.msk.f32.gmra.mrb[30].mxu0 %vm90_vm1, %v3662_v44 }
0x2426   :  { %v2724_v7 = vpop.f32.mrb[28].mxu0 }
0x2427   :  { %v2036_v8 = vadd.f32 %v2724_v7, %v3397_v24  ;;  %v2030_v9 = vpop.f32.mrb[29].mxu0 }
0x2428   :  { %v2031_v10 = vadd.f32 %v2030_v9, %v3399_v25 }
0x2429   :  { %v2377_v11 = vmul.f32 -1.442695, %v2036_v8 }
0x242a   :  { %v2376_v12 = vmul.f32 -1.442695, %v2031_v10  ;;  %v2727_v13 = vpop.f32.mrb[30].mxu0 }
0x242b   :  { %3198 = vpow2.f32 %v2377_v11  ;;  %v2040_v14 = vpop.f32.mrb[31].mxu0  ;;  %v2046_v18 = vadd.f32 %v2727_v13, %v3406_v37 }
0x242c   :  { %3200 = vpow2.f32 %v2376_v12  ;;  %v2041_v16 = vadd.f32 %v2040_v14, %v3403_v33 }
0x242d   :  { %v2379_v28 = vmul.f32 -1.442695, %v2046_v18 }
0x242e   :  { %v2378_v17 = vmul.f32 -1.442695, %v2041_v16 }
0x2430   :  { %3202 = vpow2.f32 %v2378_v17 }
0x2435   :  { %v3199_v20 = vpop.eup %3198 }
0x2436   :  { %v3201_v26 = vpop.eup %3200  ;;  %v2062_v27 = vadd.f32 1.0, %v3199_v20 }
0x2437   :  { %v2061_v29 = vadd.f32 1.0, %v3201_v26 }
0x2438   :  { %3204 = vrcp.f32 %v2062_v27 }
0x2439   :  { %3206 = vrcp.f32 %v2061_v29 }
0x243a   :  { %v3203_v30 = vpop.eup %3202  ;;  %3208 = vpow2.f32 %v2379_v28 }
0x243b   :  { %v2063_v31 = vadd.f32 1.0, %v3203_v30 }
0x243d   :  { %3210 = vrcp.f32 %v2063_v31 }
0x2442   :  { %v3205_v32 = vpop.eup %3204 }
0x2443   :  { %v3207_v34 = vpop.eup %3206 }
0x2444   :  { %v3209_v3 = vpop.eup %3208  ;;  %v2074_v35 = vmul.f32 %v3207_v34, %v3205_v32 }
0x2445   :  { %v2064_v38 = vadd.f32 1.0, %v3209_v3 }
0x2447   :  { %v3211_v36 = vpop.eup %3210  ;;  %3212 = vrcp.f32 %v2064_v38 }
0x2448   :  { %v2073_v39 = vmul.f32 %v3211_v36, %v1942_v59 }
0x244a   :  { %v2075_v40 = vadd.f32 %v2074_v35, %v2073_v39 }
0x244c   :  { %3214 = vtanh.f32 %v2075_v40 }
0x2451   :  { %v3213_v41 = vpop.eup %3212 }
0x2456   :  { %v3215_v45 = vpop.eup %3214 }
0x2457   :  { %v2077_v46 = vmul.f32 %v3215_v45, %v3213_v41 }
0x2459   :  { %2080 = vrot.lane.b32.xlu1 %v2077_v46, %s3290_s26  ;;  %2079 = vst.msk [vmem:[#allocation5 + $0x70] sm:$0xff] %vm90_vm1, %v2077_v46 }
0x24cb   :  { %v2081_v61 = vpop.permute.xlu1 %2080 }
0x24cc   :  { %v2082_v47 = vsel %vm73_vm0, %v2081_v61, %v2077_v46 }
0x24cd   :  { %2083 = vrot.lane.b32.xlu0 %v2082_v47, %s3290_s26  ;;  %s2218_s26 = sshll.u32 %s3295_s1, 4  ;;  %s2219_s26 = int_to_ptr.vmem [resolvable:$true] %s2218_s26 }
0x24ce   :  { %s3260_s27 = scalar_lea.vmem %s2219_s26, 2048  ;;  %p3265_p9 = scmp.lt.s32.totalorder %s2219_s26, %s2219_s26 }
0x24cf   :  { %p3261_p8 = scmp.ne.s32.totalorder %s2219_s26, %s3260_s27  ;;  %p3266_p10 = scmp.lt.s32.totalorder %s3260_s27, %s3260_s27 }
0x24d1   :  { %p3267_p11 = por %p3266_p10, %p3265_p9 }
0x24d3   :  { %p3268_p12 = pnand %p3267_p11, %p3261_p8 }
0x253f   :  { %v2084_v48 = vpop.permute.xlu0 %2083 }
0x2540   :  { %v2085_v49 = vsel %vm73_vm0, %v2084_v48, %v2077_v46 }
0x2541   :  { %2091 = vrot.lane.b32.xlu0 %v2085_v49, %s3293_s4  ;;  %2087 = vrot.lane.b32.xlu1 %v2085_v49, %s3291_s0 }
0x25b3   :  { %v2092_v51 = vpop.permute.xlu0 %2091  ;;  %v2088_v52 = vpop.permute.xlu1 %2087 }
0x25b4   :  { %v2922_v53 = vpack.c.bf16 %v2077_v46, %v2088_v52  ;;  %v2928_v54 = vpack.c.bf16 %v2096_v50, %v2092_v51 }
0x25b6   :  { %2924 = vmatprep.subr.msk.bf16.mxu1 %vm3358_vm4, %v2922_v53 }
0x25b7   :  { %2927 = vmatpush3.bf16.msk.msra.mxu1 %vm3358_vm4, %v2922_v53 }
0x25b8   :  { %2930 = vmatprep.subr.msk.bf16.mxu1 %vm3366_vm6, %v2928_v54 }
0x25bb   :  { %2933 = vmatpush3.bf16.msk.msra.mxu1 %vm3366_vm6, %v2928_v54 }
0x25be   :  { %2737 = vmatmul.mubr.msk.f32.vlgmr.msra.gmra.mrb[28].mxu1 %vm90_vm1, %v3648_v42 }
0x25bf   :  { %2739 = vmatprep.mubr.msk.f32.mxu1 %vm90_vm1, %v3655_v43 }
0x25c2   :  { %2740 = vmatmul.mubr.msk.f32.gmra.mrb[30].mxu1 %vm90_vm1, %v3662_v44 }
0x2691   :  { %v2738_v55 = vpop.f32.mrb[28].mxu1 }
0x2692   :  { %v2169_v56 = vadd.f32 %v2738_v55, %v3397_v24  ;;  %v2163_v15 = vpop.f32.mrb[29].mxu1 }
0x2693   :  { %v2164_v57 = vadd.f32 %v2163_v15, %v3399_v25 }
0x2694   :  { %v2387_v58 = vmul.f32 -1.442695, %v2169_v56 }
0x2695   :  { %v2386_v59 = vmul.f32 -1.442695, %v2164_v57  ;;  %v2741_v60 = vpop.f32.mrb[30].mxu1 }
0x2696   :  { %3216 = vpow2.f32 %v2387_v58  ;;  %v2173_v19 = vpop.f32.mrb[31].mxu1  ;;  %v2179_v43 = vadd.f32 %v2741_v60, %v3406_v37 }
0x2697   :  { %3218 = vpow2.f32 %v2386_v59  ;;  %v2174_v42 = vadd.f32 %v2173_v19, %v3403_v33 }
0x2698   :  { %v2389_v21 = vmul.f32 -1.442695, %v2179_v43 }
0x2699   :  { %v2388_v62 = vmul.f32 -1.442695, %v2174_v42 }
0x269b   :  { %3220 = vpow2.f32 %v2388_v62 }
0x26a0   :  { %v3217_v63 = vpop.eup %3216 }
0x26a1   :  { %v3219_v44 = vpop.eup %3218  ;;  %v2195_v0 = vadd.f32 1.0, %v3217_v63 }
0x26a2   :  { %v2194_v24 = vadd.f32 1.0, %v3219_v44 }
0x26a3   :  { %3222 = vrcp.f32 %v2195_v0 }
0x26a4   :  { %3224 = vrcp.f32 %v2194_v24 }
0x26a5   :  { %v3221_v25 = vpop.eup %3220  ;;  %3226 = vpow2.f32 %v2389_v21 }
0x26a6   :  { %v2196_v1 = vadd.f32 1.0, %v3221_v25 }
0x26a8   :  { %3228 = vrcp.f32 %v2196_v1 }
0x26ad   :  { %v3223_v2 = vpop.eup %3222 }
0x26ae   :  { %v3225_v22 = vpop.eup %3224 }
0x26af   :  { %v3227_v4 = vpop.eup %3226  ;;  %v2207_v23 = vmul.f32 %v3225_v22, %v3223_v2 }
0x26b0   :  { %v2197_v5 = vadd.f32 1.0, %v3227_v4 }
0x26b2   :  { %v3229_v33 = vpop.eup %3228  ;;  %3230 = vrcp.f32 %v2197_v5 }
0x26b3   :  { %v2206_v6 = vmul.f32 %v3229_v33, %v2075_v40 }
0x26b5   :  { %v2208_v7 = vadd.f32 %v2207_v23, %v2206_v6 }
0x26b7   :  { %3232 = vtanh.f32 %v2208_v7 }
0x26bc   :  { %v3231_v37 = vpop.eup %3230 }
0x26c1   :  { %v3233_v8 = vpop.eup %3232 }
0x26c2   :  { %v2210_v9 = vmul.f32 %v3233_v8, %v3231_v37 }
0x26c4   :  { %2212 = vst.msk [vmem:[#allocation5 + $0x78] sm:$0xff] %vm90_vm1, %v2210_v9 }
0x26c5   :  { %3271 = shalt.err (!%p3268_p12)
}
0x26c6   :  { %s3272_s29 = scalar_lea.hbm %s3849_s3, 2048 }
0x26c7   :  { %p3273_p13 = scmp.ne.s32.totalorder %s3849_s3, %s3272_s29  ;;  %p3276_p0 = scmp.lt.u32.totalorder %s3272_s29, %s3849_s3 }
0x26c9   :  { %p3278_p1 = pnand %p3276_p0, %p3273_p13 }
0x26cb   :  { %3281 = shalt.err (!%p3278_p1)
}
0x26cc   :  { %2224 = dma.vmem_to_hbm [thread:$0]  %s2219_s26, 2048, %s3849_s3, [#allocation4], %s3287_s22, %s3287_s22, %s3288_s23  }
0x26cd   :  { %3284 = dma.done.wait [#allocation4], 2048  }
0x26ce   :  { %3285 = vsyncadd [#allocation4], 4294965248 }
0x26cf   :  { %2228 = vsyncpa [#allocation3], 1 }
0x26d0   :  { %2229 = vsyncpa [#allocation4], 1 }

</bundles_post_ra>
